<compile_context>
chip_gen: v6e
topology: v6e:2x2x1
jax: 0.10.0
libtpu: 0.0.40
codegen_flags: <defaults>
</compile_context>

<pallas_src>
import jax
import jax.numpy as jnp
from jax import lax
from jax.experimental import pallas as pl
from jax.experimental.pallas import tpu as pltpu

NUM_E2E = 3
NUM_CLASSES = 7
CONV_SIZE = 64
HIDDEN_SIZE = 48
BN_EPS = 1e-5

# Whole-array-resident-in-VMEM spec (no grid, no index map).
VMEM_SPEC = pl.BlockSpec(memory_space=pltpu.MemorySpace.VMEM)


# ---------------------------------------------------------------------------
# Pallas kernels
# ---------------------------------------------------------------------------
def _conv_gemm_kernel(x_ref, w_ref, scale_ref, shift_ref, o_ref):
    # out = BN_affine(relu(cols @ w))   -- Conv -> ReLU -> BatchNorm (eval) order
    acc = jnp.dot(x_ref[...], w_ref[...], preferred_element_type=jnp.float32)
    acc = jnp.maximum(acc, 0.0)
    acc = acc * scale_ref[...] + shift_ref[...]
    o_ref[...] = acc.astype(o_ref.dtype)


def _dot_nt(a, b):
    # a: (M, K), b: (N, K) -> (M, N).  Contract last dim of both (q @ k^T form).
    return lax.dot_general(a, b, dimension_numbers=(((1,), (1,)), ((), ())),
                           preferred_element_type=jnp.float32)


def _fc_tail_kernel(x_ref, w1_ref, b1_ref, w2_ref, b2_ref, wh_ref, bh_ref, o_ref):
    # linear1 -> linear2 -> concatenated heads (head BN already folded into wh/bh).
    # Weights arrive in torch (out, in) layout; all matmuls are NT-form.
    # Intermediates ((B,24), (B,12)) stay in vregs/VMEM; single (B,9) store.
    h = _dot_nt(x_ref[...], w1_ref[...]) + b1_ref[...]
    h = _dot_nt(h, w2_ref[...]) + b2_ref[...]
    out = _dot_nt(h, wh_ref[...]) + bh_ref[...]
    o_ref[...] = out.astype(o_ref.dtype)


def conv_gemm_fused(cols, w, scale, shift, out_dtype=jnp.float32):
    """cols: (M, K), w: (K, N) -> (M, N). bf16 MXU operands, f32 epilogue."""
    M, K = cols.shape
    K2, N = w.shape
    assert K == K2
    return pl.pallas_call(
        _conv_gemm_kernel,
        out_shape=jax.ShapeDtypeStruct((M, N), out_dtype),
        in_specs=[VMEM_SPEC] * 4,
        out_specs=VMEM_SPEC,
    )(
        cols.astype(jnp.bfloat16),
        w.astype(jnp.bfloat16),
        scale.reshape(1, N).astype(jnp.float32),
        shift.reshape(1, N).astype(jnp.float32),
    )


def fc_tail_fused(flat, w1, b1, w2, b2, wh, bh):
    """flat: (B, 3456) -> (B, 9), both heads concatenated (lane-dense store).

    w1: (24, 3456), w2: (12, 24), wh: (9, 12)  -- torch (out, in) layout.
    """
    B = flat.shape[0]
    N = wh.shape[0]
    return pl.pallas_call(
        _fc_tail_kernel,
        out_shape=jax.ShapeDtypeStruct((B, N), jnp.float32),
        in_specs=[VMEM_SPEC] * 7,
        out_specs=VMEM_SPEC,
    )(
        flat.astype(jnp.float32),
        w1.astype(jnp.float32), b1.reshape(1, -1).astype(jnp.float32),
        w2.astype(jnp.float32), b2.reshape(1, -1).astype(jnp.float32),
        wh.astype(jnp.float32), bh.reshape(1, -1).astype(jnp.float32),
    )


# ---------------------------------------------------------------------------
# Trace-time glue (cheap XLA ops, no activation transposes)
# ---------------------------------------------------------------------------
def im2col_nhwc(x, ksize=4, stride=2, pad=1):
    """NHWC im2col for Conv2d(k=4, s=2, p=1). Column order is (kh, kw, cin)."""
    B, H, W, C = x.shape
    OH = (H + 2 * pad - ksize) // stride + 1
    OW = (W + 2 * pad - ksize) // stride + 1
    xp = jnp.pad(x, ((0, 0), (pad, pad), (pad, pad), (0, 0)))
    taps = [
        xp[:, kh:kh + stride * OH:stride, kw:kw + stride * OW:stride, :]
        for kh in range(ksize) for kw in range(ksize)
    ]
    cols = jnp.concatenate(taps, axis=-1)          # (B, OH, OW, k*k*C)
    return cols.reshape(B * OH * OW, ksize * ksize * C), OH, OW


def conv_w_to_gemm(w):
    """torch conv weight (Cout, Cin, kh, kw) -> (kh*kw*Cin, Cout) (matches im2col_nhwc)."""
    cout = w.shape[0]
    return jnp.transpose(w, (2, 3, 1, 0)).reshape(-1, cout)


def bn_scale_shift(gamma, beta, mean, var, eps=BN_EPS):
    scale = gamma / jnp.sqrt(var + eps)
    shift = beta - mean * scale
    return scale, shift


# ---------------------------------------------------------------------------
# Forward pass matching LSTM.forward (eval-mode BN)
# ---------------------------------------------------------------------------
def lstm_forward(p, x):
    B = x.shape[0]
    # NCHW -> NHWC once; bf16 once so the im2col glue moves half the bytes.
    x = jnp.transpose(x, (0, 2, 3, 1)).astype(jnp.bfloat16)

    # conv1: Conv2d(3, 64, 4, 2, 1, bias=False) -> ReLU -> BatchNorm2d(64)
    cols1, oh1, ow1 = im2col_nhwc(x)                       # (B*OH1*OW1, 48) bf16
    w1 = conv_w_to_gemm(p["conv1_w"])                      # (48, 64)
    s1, sh1 = bn_scale_shift(p["bn1_g"], p["bn1_b"], p["bn1_m"], p["bn1_v"])
    y1 = conv_gemm_fused(cols1, w1, s1, sh1, out_dtype=jnp.bfloat16)
    y1 = y1.reshape(B, oh1, ow1, CONV_SIZE)                # stays NHWC

    # conv2: Conv2d(64, 48, 4, 2, 1, bias=False) -> ReLU -> BatchNorm2d(48)
    cols2, oh2, ow2 = im2col_nhwc(y1)                      # (B*72, 1024) bf16
    w2 = conv_w_to_gemm(p["conv2_w"])                      # (1024, 48)
    s2, sh2 = bn_scale_shift(p["bn2_g"], p["bn2_b"], p["bn2_m"], p["bn2_v"])
    y2 = conv_gemm_fused(cols2, w2, s2, sh2, out_dtype=jnp.float32)   # (B*72, 48)

    # NHWC flatten (index = s*48 + c); linear1 columns permuted to match the
    # torch NCHW .view() flatten (index = c*72 + s) once at trace time.  The
    # weight stays in (out, in) layout for the NT-form kernel matmul.
    S = oh2 * ow2                                          # 72
    flat = y2.reshape(B, S * HIDDEN_SIZE)                  # (B, 3456)
    l1w = (p["l1_w"].reshape(-1, HIDDEN_SIZE, S)           # (24, 48, 72)
           .transpose(0, 2, 1)                             # (24, 72, 48)
           .reshape(-1, S * HIDDEN_SIZE))                  # (24, 3456)

    # Fold each head's eval-mode BatchNorm1d(1) into its linear weight/bias,
    # then concatenate both heads into one lane-dense (9, 12) weight.
    sD, shD = bn_scale_shift(p["nDiog_g"], p["nDiog_b"], p["nDiog_m"], p["nDiog_v"])
    sA, shA = bn_scale_shift(p["nDect_g"], p["nDect_b"], p["nDect_m"], p["nDect_v"])
    wD = p["lDiog_w"] * sD[0]
    bD = p["lDiog_b"] * sD[0] + shD[0]
    wA = p["lDect_w"] * sA[0]
    bA = p["lDect_b"] * sA[0] + shA[0]
    wh = jnp.concatenate([wD, wA], axis=0)                 # (9, 12)
    bh = jnp.concatenate([bD, bA], axis=0)                 # (9,)

    out9 = fc_tail_fused(flat, l1w, p["l1_b"], p["l2_w"], p["l2_b"], wh, bh)
    out_type = out9[:, :NUM_CLASSES]                       # (B, 7)
    out_anomaly = out9[:, NUM_CLASSES:]                    # (B, 2)
    return out_type, out_anomaly


# ---------------------------------------------------------------------------
# Deterministic parameter construction
# ---------------------------------------------------------------------------
def init_params(key):
    keys = jax.random.split(key, 20)
    k = iter(keys)

    def rn(shape, scale=0.1):
        return scale * jax.random.normal(next(k), shape, jnp.float32)

    params = {
        # Conv2d(3, 64, 4, 4), no bias
        "conv1_w": rn((CONV_SIZE, NUM_E2E, 4, 4)),
        "bn1_g": 1.0 + rn((CONV_SIZE,)),
        "bn1_b": rn((CONV_SIZE,)),
        "bn1_m": rn((CONV_SIZE,)),
        "bn1_v": 1.0 + jnp.abs(rn((CONV_SIZE,))),
        # Conv2d(64, 48, 4, 4), no bias
        "conv2_w": rn((HIDDEN_SIZE, CONV_SIZE, 4, 4), 0.05),
        "bn2_g": 1.0 + rn((HIDDEN_SIZE,)),
        "bn2_b": rn((HIDDEN_SIZE,)),
        "bn2_m": rn((HIDDEN_SIZE,)),
        "bn2_v": 1.0 + jnp.abs(rn((HIDDEN_SIZE,))),
        # Linear(3456, 24)
        "l1_w": rn((24, 72 * HIDDEN_SIZE), 0.02),
        "l1_b": rn((24,)),
        # Linear(24, 12)
        "l2_w": rn((12, 24)),
        "l2_b": rn((12,)),
        # Linear(12, 7) + BatchNorm1d(1)
        "lDiog_w": rn((NUM_CLASSES, 12)),
        "lDiog_b": rn((NUM_CLASSES,)),
        "nDiog_g": jnp.asarray([1.2], jnp.float32),
        "nDiog_b": jnp.asarray([0.1], jnp.float32),
        "nDiog_m": jnp.asarray([0.05], jnp.float32),
        "nDiog_v": jnp.asarray([0.9], jnp.float32),
        # Linear(12, 2) + BatchNorm1d(1)
        "lDect_w": rn((2, 12)),
        "lDect_b": rn((2,)),
        "nDect_g": jnp.asarray([0.8], jnp.float32),
        "nDect_b": jnp.asarray([-0.2], jnp.float32),
        "nDect_m": jnp.asarray([-0.1], jnp.float32),
        "nDect_v": jnp.asarray([1.1], jnp.float32),
    }
    return params


if __name__ == "__main__":
    key = jax.random.PRNGKey(0)
    pkey, xkey = jax.random.split(key)
    params = init_params(pkey)

    # Input spatial size must satisfy (H/4)*(W/4) == 72 (linear1 takes 72*48).
    # Use H=36, W=32 -> conv1: 18x16 -> conv2: 9x8 (9*8 = 72).
    B = 2
    x = jax.random.normal(xkey, (B, NUM_E2E, 36, 32), jnp.float32)

    fwd = jax.jit(lstm_forward)
    out_type, out_anomaly = fwd(params, x)
    jax.block_until_ready((out_type, out_anomaly))

    assert out_type.shape == (B, NUM_CLASSES)
    assert out_anomaly.shape == (B, 2)
    print("KERNEL_OK")
</pallas_src>

<mosaic_0001>
module attributes {stable_mosaic.version = 11 : i64} {
  func.func @_conv_gemm_kernel(%arg0: memref<576x48xbf16, #tpu.memory_space<vmem>>, %arg1: memref<48x64xbf16, #tpu.memory_space<vmem>>, %arg2: memref<1x64xf32, #tpu.memory_space<vmem>>, %arg3: memref<1x64xf32, #tpu.memory_space<vmem>>, %arg4: memref<576x64xbf16, #tpu.memory_space<vmem>>) attributes {dimension_semantics = [], scalar_prefetch = 0 : i64, scratch_operands = 0 : i64, tpu.core_type = #tpu.core_type<tc>} {
    %c0 = arith.constant 0 : index
    %c0_0 = arith.constant 0 : index
    %0 = vector.load %arg0[%c0, %c0_0] : memref<576x48xbf16, #tpu.memory_space<vmem>>, vector<576x48xbf16>
    %c0_1 = arith.constant 0 : index
    %c0_2 = arith.constant 0 : index
    %1 = vector.load %arg1[%c0_1, %c0_2] : memref<48x64xbf16, #tpu.memory_space<vmem>>, vector<48x64xbf16>
    %cst = arith.constant dense<0.000000e+00> : vector<576x64xf32>
    %2 = tpu.matmul %0, %1, %cst {dimension_numbers = #tpu.dot_dimension_numbers<[1], [0], [0], [1], [0, 0, 1, 1], [], []>} : vector<576x48xbf16>, vector<48x64xbf16>, vector<576x64xf32> -> vector<576x64xf32>
    %cst_3 = arith.constant 0.000000e+00 : f32
    %3 = vector.broadcast %cst_3 : f32 to vector<576x64xf32>
    %4 = arith.maximumf %2, %3 : vector<576x64xf32>
    %c0_4 = arith.constant 0 : index
    %c0_5 = arith.constant 0 : index
    %5 = vector.load %arg2[%c0_4, %c0_5] : memref<1x64xf32, #tpu.memory_space<vmem>>, vector<1x64xf32>
    %6 = vector.broadcast %5 : vector<1x64xf32> to vector<576x64xf32>
    %7 = arith.mulf %4, %6 : vector<576x64xf32>
    %c0_6 = arith.constant 0 : index
    %c0_7 = arith.constant 0 : index
    %8 = vector.load %arg3[%c0_6, %c0_7] : memref<1x64xf32, #tpu.memory_space<vmem>>, vector<1x64xf32>
    %9 = vector.broadcast %8 : vector<1x64xf32> to vector<576x64xf32>
    %10 = arith.addf %7, %9 : vector<576x64xf32>
    %11 = arith.truncf %10 : vector<576x64xf32> to vector<576x64xbf16>
    %c0_8 = arith.constant 0 : index
    %c0_9 = arith.constant 0 : index
    %12 = vector.load %arg4[%c0_8, %c0_9] : memref<576x64xbf16, #tpu.memory_space<vmem>>, vector<576x64xbf16>
    tpu.vector_store %arg4[%c0_8, %c0_9], %11 {strides = array<i32>} : memref<576x64xbf16, #tpu.memory_space<vmem>>, vector<576x64xbf16>,
    return
  }
}

module attributes {stable_mosaic.version = 11 : i64} {
  func.func @_conv_gemm_kernel(%arg0: memref<144x1024xbf16, #tpu.memory_space<vmem>>, %arg1: memref<1024x48xbf16, #tpu.memory_space<vmem>>, %arg2: memref<1x48xf32, #tpu.memory_space<vmem>>, %arg3: memref<1x48xf32, #tpu.memory_space<vmem>>, %arg4: memref<144x48xf32, #tpu.memory_space<vmem>>) attributes {dimension_semantics = [], scalar_prefetch = 0 : i64, scratch_operands = 0 : i64, tpu.core_type = #tpu.core_type<tc>} {
    %c0 = arith.constant 0 : index
    %c0_0 = arith.constant 0 : index
    %0 = vector.load %arg0[%c0, %c0_0] : memref<144x1024xbf16, #tpu.memory_space<vmem>>, vector<144x1024xbf16>
    %c0_1 = arith.constant 0 : index
    %c0_2 = arith.constant 0 : index
    %1 = vector.load %arg1[%c0_1, %c0_2] : memref<1024x48xbf16, #tpu.memory_space<vmem>>, vector<1024x48xbf16>
    %cst = arith.constant dense<0.000000e+00> : vector<144x48xf32>
    %2 = tpu.matmul %0, %1, %cst {dimension_numbers = #tpu.dot_dimension_numbers<[1], [0], [0], [1], [0, 0, 1, 1], [], []>} : vector<144x1024xbf16>, vector<1024x48xbf16>, vector<144x48xf32> -> vector<144x48xf32>
    %cst_3 = arith.constant 0.000000e+00 : f32
    %3 = vector.broadcast %cst_3 : f32 to vector<144x48xf32>
    %4 = arith.maximumf %2, %3 : vector<144x48xf32>
    %c0_4 = arith.constant 0 : index
    %c0_5 = arith.constant 0 : index
    %5 = vector.load %arg2[%c0_4, %c0_5] : memref<1x48xf32, #tpu.memory_space<vmem>>, vector<1x48xf32>
    %6 = vector.broadcast %5 : vector<1x48xf32> to vector<144x48xf32>
    %7 = arith.mulf %4, %6 : vector<144x48xf32>
    %c0_6 = arith.constant 0 : index
    %c0_7 = arith.constant 0 : index
    %8 = vector.load %arg3[%c0_6, %c0_7] : memref<1x48xf32, #tpu.memory_space<vmem>>, vector<1x48xf32>
    %9 = vector.broadcast %8 : vector<1x48xf32> to vector<144x48xf32>
    %10 = arith.addf %7, %9 : vector<144x48xf32>
    %c0_8 = arith.constant 0 : index
    %c0_9 = arith.constant 0 : index
    %11 = vector.load %arg4[%c0_8, %c0_9] : memref<144x48xf32, #tpu.memory_space<vmem>>, vector<144x48xf32>
    tpu.vector_store %arg4[%c0_8, %c0_9], %10 {strides = array<i32>} : memref<144x48xf32, #tpu.memory_space<vmem>>, vector<144x48xf32>,
    return
  }
}

module attributes {stable_mosaic.version = 11 : i64} {
  func.func @_fc_tail_kernel(%arg0: memref<2x3456xf32, #tpu.memory_space<vmem>>, %arg1: memref<24x3456xf32, #tpu.memory_space<vmem>>, %arg2: memref<1x24xf32, #tpu.memory_space<vmem>>, %arg3: memref<12x24xf32, #tpu.memory_space<vmem>>, %arg4: memref<1x12xf32, #tpu.memory_space<vmem>>, %arg5: memref<9x12xf32, #tpu.memory_space<vmem>>, %arg6: memref<1x9xf32, #tpu.memory_space<vmem>>, %arg7: memref<2x9xf32, #tpu.memory_space<vmem>>) attributes {dimension_semantics = [], scalar_prefetch = 0 : i64, scratch_operands = 0 : i64, tpu.core_type = #tpu.core_type<tc>} {
    %c0 = arith.constant 0 : index
    %c0_0 = arith.constant 0 : index
    %0 = vector.load %arg0[%c0, %c0_0] : memref<2x3456xf32, #tpu.memory_space<vmem>>, vector<2x3456xf32>
    %c0_1 = arith.constant 0 : index
    %c0_2 = arith.constant 0 : index
    %1 = vector.load %arg1[%c0_1, %c0_2] : memref<24x3456xf32, #tpu.memory_space<vmem>>, vector<24x3456xf32>
    %cst = arith.constant dense<0.000000e+00> : vector<2x24xf32>
    %2 = tpu.matmul %0, %1, %cst {dimension_numbers = #tpu.dot_dimension_numbers<[1], [1], [0], [0], [0, 0, 1, 0], [], []>} : vector<2x3456xf32>, vector<24x3456xf32>, vector<2x24xf32> -> vector<2x24xf32>
    %c0_3 = arith.constant 0 : index
    %c0_4 = arith.constant 0 : index
    %3 = vector.load %arg2[%c0_3, %c0_4] : memref<1x24xf32, #tpu.memory_space<vmem>>, vector<1x24xf32>
    %4 = vector.broadcast %3 : vector<1x24xf32> to vector<2x24xf32>
    %5 = arith.addf %2, %4 : vector<2x24xf32>
    %c0_5 = arith.constant 0 : index
    %c0_6 = arith.constant 0 : index
    %6 = vector.load %arg3[%c0_5, %c0_6] : memref<12x24xf32, #tpu.memory_space<vmem>>, vector<12x24xf32>
    %cst_7 = arith.constant dense<0.000000e+00> : vector<2x12xf32>
    %7 = tpu.matmul %5, %6, %cst_7 {dimension_numbers = #tpu.dot_dimension_numbers<[1], [1], [0], [0], [0, 0, 1, 0], [], []>} : vector<2x24xf32>, vector<12x24xf32>, vector<2x12xf32> -> vector<2x12xf32>
    %c0_8 = arith.constant 0 : index
    %c0_9 = arith.constant 0 : index
    %8 = vector.load %arg4[%c0_8, %c0_9] : memref<1x12xf32, #tpu.memory_space<vmem>>, vector<1x12xf32>
    %9 = vector.broadcast %8 : vector<1x12xf32> to vector<2x12xf32>
    %10 = arith.addf %7, %9 : vector<2x12xf32>
    %c0_10 = arith.constant 0 : index
    %c0_11 = arith.constant 0 : index
    %11 = vector.load %arg5[%c0_10, %c0_11] : memref<9x12xf32, #tpu.memory_space<vmem>>, vector<9x12xf32>
    %cst_12 = arith.constant dense<0.000000e+00> : vector<2x9xf32>
    %12 = tpu.matmul %10, %11, %cst_12 {dimension_numbers = #tpu.dot_dimension_numbers<[1], [1], [0], [0], [0, 0, 1, 0], [], []>} : vector<2x12xf32>, vector<9x12xf32>, vector<2x9xf32> -> vector<2x9xf32>
    %c0_13 = arith.constant 0 : index
    %c0_14 = arith.constant 0 : index
    %13 = vector.load %arg6[%c0_13, %c0_14] : memref<1x9xf32, #tpu.memory_space<vmem>>, vector<1x9xf32>
    %14 = vector.broadcast %13 : vector<1x9xf32> to vector<2x9xf32>
    %15 = arith.addf %12, %14 : vector<2x9xf32>
    %c0_15 = arith.constant 0 : index
    %c0_16 = arith.constant 0 : index
    %16 = vector.load %arg7[%c0_15, %c0_16] : memref<2x9xf32, #tpu.memory_space<vmem>>, vector<2x9xf32>
    tpu.vector_store %arg7[%c0_15, %c0_16], %15 {strides = array<i32>} : memref<2x9xf32, #tpu.memory_space<vmem>>, vector<2x9xf32>,
    return
  }
}

</mosaic_0001>

<bundles_post_ra>
// kernel: lstm_forward.3
= control target key start
LH: loop header
LB: loop body
LE: loop exit
PB: predicated region body
PF: predicated region fallthrough
CT: control target
= control target key end

     0   :  { %vm294_vm0 = vcmask 392192   ;;  %vm1242_vm1 = vcmask 519168   ;;  %s2322_s1 = inlined_call_operand.vmem [shape: bf16[48,64], index: 1, kind: input, shape index: {}]   ;;  %s2323_s0 = inlined_call_operand.vmem [shape: bf16[576,48], index: 0, kind: input, shape index: {}]   ;;  %s2324_s2 = inlined_call_operand.vmem [shape: f32[1,64], index: 2, kind: input, shape index: {}]   ;;  %s2325_s3 = inlined_call_operand.vmem [shape: f32[1,64], index: 3, kind: input, shape index: {}]   ;;  %s2326_s4 = inlined_call_operand.vmem [shape: bf16[576,64], index: 4, kind: output, shape index: {}]  }
   0x1   :  { %v1663_v0 = vld [vmem:[%s2322_s1 + $0x10] sm:$0xff]   ;;  %v1664_v1 = vld [vmem:[%s2322_s1 + $0x8] sm:$0xff]   ;;  %v1665_v2 = vld [vmem:[%s2322_s1] sm:$0xff]  }
   0x2   :  { %1579 = vmatprep.subr.bf16.mxu0 %v1663_v0  ;;  %1657 = vmatprep.subr.bf16.mxu1 %v1663_v0  ;;  %v1666_v3 = vld [vmem:[%s2323_s0] sm:$0xff]   ;;  %v1667_v4 = vld [vmem:[%s2323_s0 + $0x90] sm:$0xff]   ;;  %v1668_v5 = vld [vmem:[%s2323_s0 + $0x8] sm:$0xff]  }
   0x3   :  { %1580 = vmatpush3.bf16.msra.mxu0 %v1663_v0  ;;  %1660 = vmatpush3.bf16.msra.mxu1 %v1663_v0  ;;  %v1669_v6 = vld [vmem:[%s2323_s0 + $0x98] sm:$0xff]   ;;  %v1670_v7 = vld [vmem:[%s2323_s0 + $0x10] sm:$0xff]   ;;  %v1671_v8 = vld [vmem:[%s2323_s0 + $0xa0] sm:$0xff]  }
   0x4   :  { %1581 = vmatprep.subr.bf16.mxu0 %v1664_v1  ;;  %1658 = vmatprep.subr.bf16.mxu1 %v1664_v1  ;;  %v1672_v9 = vld [vmem:[%s2323_s0 + $0x18] sm:$0xff]   ;;  %v1673_v10 = vld [vmem:[%s2323_s0 + $0xa8] sm:$0xff]   ;;  %v1674_v11 = vld [vmem:[%s2323_s0 + $0x20] sm:$0xff]  }
   0x5   :  { %1585 = vmatprep.mubr.msk.bf16.mxu0 %vm294_vm0, %v1666_v3  ;;  %1621 = vmatprep.mubr.msk.bf16.mxu1 %vm294_vm0, %v1667_v4  ;;  %v1675_v12 = vld [vmem:[%s2323_s0 + $0xb0] sm:$0xff]   ;;  %v1676_v13 = vld [vmem:[%s2323_s0 + $0x28] sm:$0xff]   ;;  %v1677_v14 = vld [vmem:[%s2323_s0 + $0xb8] sm:$0xff]  }
   0x6   :  { %v1678_v15 = vld [vmem:[%s2323_s0 + $0x30] sm:$0xff]   ;;  %v1679_v16 = vld [vmem:[%s2323_s0 + $0xc0] sm:$0xff]   ;;  %v1680_v17 = vld [vmem:[%s2323_s0 + $0x38] sm:$0xff]  }
   0x7   :  { %1582 = vmatpush3.bf16.msra.mxu0 %v1664_v1  ;;  %1661 = vmatpush3.bf16.msra.mxu1 %v1664_v1  ;;  %v1681_v18 = vld [vmem:[%s2323_s0 + $0xc8] sm:$0xff]   ;;  %v1682_v19 = vld [vmem:[%s2323_s0 + $0x40] sm:$0xff]   ;;  %v1683_v20 = vld [vmem:[%s2323_s0 + $0xd0] sm:$0xff]  }
   0x8   :  { %1583 = vmatprep.subr.bf16.mxu0 %v1665_v2  ;;  %1659 = vmatprep.subr.bf16.mxu1 %v1665_v2  ;;  %v1684_v21 = vld [vmem:[%s2323_s0 + $0x48] sm:$0xff]   ;;  %v1685_v22 = vld [vmem:[%s2323_s0 + $0xd8] sm:$0xff]   ;;  %v1686_v23 = vld [vmem:[%s2323_s0 + $0x50] sm:$0xff]  }
   0x9   :  { %v1687_v24 = vld [vmem:[%s2323_s0 + $0xe0] sm:$0xff]   ;;  %v1688_v25 = vld [vmem:[%s2323_s0 + $0x58] sm:$0xff]   ;;  %v1689_v26 = vld [vmem:[%s2323_s0 + $0xe8] sm:$0xff]  }
   0xa   :  { %v1690_v27 = vld [vmem:[%s2323_s0 + $0x60] sm:$0xff]   ;;  %v1691_v28 = vld [vmem:[%s2323_s0 + $0xf0] sm:$0xff]   ;;  %v1692_v29 = vld [vmem:[%s2323_s0 + $0x68] sm:$0xff]  }
   0xb   :  { %1584 = vmatpush3.bf16.msra.mxu0 %v1665_v2  ;;  %1662 = vmatpush3.bf16.msra.mxu1 %v1665_v2  ;;  %v1693_v30 = vld [vmem:[%s2323_s0 + $0xf8] sm:$0xff]   ;;  %v1694_v31 = vld [vmem:[%s2323_s0 + $0x70] sm:$0xff]   ;;  %v1695_v32 = vld [vmem:[%s2323_s0 + $0x100] sm:$0xff]  }
   0xc   :  { %v1696_v33 = vld [vmem:[%s2323_s0 + $0x78] sm:$0xff]   ;;  %v1697_v34 = vld [vmem:[%s2323_s0 + $0x108] sm:$0xff]   ;;  %v1698_v35 = vld [vmem:[%s2323_s0 + $0x80] sm:$0xff]  }
   0xd   :  { %v1699_v36 = vld [vmem:[%s2323_s0 + $0x110] sm:$0xff]   ;;  %v1700_v37 = vld [vmem:[%s2323_s0 + $0x88] sm:$0xff]   ;;  %v1701_v38 = vld [vmem:[%s2323_s0 + $0x118] sm:$0xff]  }
   0xe   :  { %1586 = vmatmul.mubr.msk.bf16.vlgmr.msra.gmra.mxu0 %vm294_vm0, %v1668_v5  ;;  %1622 = vmatmul.mubr.msk.bf16.vlgmr.msra.gmra.mxu1 %vm294_vm0, %v1669_v6  ;;  %v1883_v40 = vld [vmem:[%s2324_s2] ss:$0 sm:$0xff] }
   0xf   :  { %1589 = vmatprep.mubr.msk.bf16.mxu0 %vm294_vm0, %v1670_v7  ;;  %1625 = vmatprep.mubr.msk.bf16.mxu1 %vm294_vm0, %v1671_v8  ;;  %v1888_v44 = vld [vmem:[%s2325_s3] ss:$0 sm:$0xff] }
  0x16   :  { %1590 = vmatmul.mubr.msk.bf16.gmra.mxu0 %vm294_vm0, %v1672_v9  ;;  %1626 = vmatmul.mubr.msk.bf16.gmra.mxu1 %vm294_vm0, %v1673_v10 }
  0x17   :  { %1593 = vmatprep.mubr.msk.bf16.mxu0 %vm294_vm0, %v1674_v11  ;;  %1629 = vmatprep.mubr.msk.bf16.mxu1 %vm294_vm0, %v1675_v12 }
  0x1e   :  { %1594 = vmatmul.mubr.msk.bf16.gmra.mxu0 %vm294_vm0, %v1676_v13  ;;  %1630 = vmatmul.mubr.msk.bf16.gmra.mxu1 %vm294_vm0, %v1677_v14 }
  0x1f   :  { %1597 = vmatprep.mubr.msk.bf16.mxu0 %vm294_vm0, %v1678_v15  ;;  %1633 = vmatprep.mubr.msk.bf16.mxu1 %vm294_vm0, %v1679_v16 }
  0x26   :  { %1598 = vmatmul.mubr.msk.bf16.gmra.mxu0 %vm294_vm0, %v1680_v17  ;;  %1634 = vmatmul.mubr.msk.bf16.gmra.mxu1 %vm294_vm0, %v1681_v18 }
  0x27   :  { %1601 = vmatprep.mubr.msk.bf16.mxu0 %vm294_vm0, %v1682_v19  ;;  %1637 = vmatprep.mubr.msk.bf16.mxu1 %vm294_vm0, %v1683_v20 }
  0x2e   :  { %1602 = vmatmul.mubr.msk.bf16.gmra.mxu0 %vm294_vm0, %v1684_v21  ;;  %1638 = vmatmul.mubr.msk.bf16.gmra.mxu1 %vm294_vm0, %v1685_v22 }
  0x2f   :  { %1605 = vmatprep.mubr.msk.bf16.mxu0 %vm294_vm0, %v1686_v23  ;;  %1641 = vmatprep.mubr.msk.bf16.mxu1 %vm294_vm0, %v1687_v24 }
  0x36   :  { %1606 = vmatmul.mubr.msk.bf16.gmra.mxu0 %vm294_vm0, %v1688_v25  ;;  %1642 = vmatmul.mubr.msk.bf16.gmra.mxu1 %vm294_vm0, %v1689_v26 }
  0x37   :  { %1609 = vmatprep.mubr.msk.bf16.mxu0 %vm294_vm0, %v1690_v27  ;;  %1645 = vmatprep.mubr.msk.bf16.mxu1 %vm294_vm0, %v1691_v28 }
  0x3e   :  { %1610 = vmatmul.mubr.msk.bf16.gmra.mxu0 %vm294_vm0, %v1692_v29  ;;  %1646 = vmatmul.mubr.msk.bf16.gmra.mxu1 %vm294_vm0, %v1693_v30 }
  0x3f   :  { %1613 = vmatprep.mubr.msk.bf16.mxu0 %vm294_vm0, %v1694_v31  ;;  %1649 = vmatprep.mubr.msk.bf16.mxu1 %vm294_vm0, %v1695_v32 }
  0x46   :  { %1614 = vmatmul.mubr.msk.bf16.gmra.mxu0 %vm294_vm0, %v1696_v33  ;;  %1650 = vmatmul.mubr.msk.bf16.gmra.mxu1 %vm294_vm0, %v1697_v34 }
  0x47   :  { %1617 = vmatprep.mubr.msk.bf16.mxu0 %vm294_vm0, %v1698_v35  ;;  %1653 = vmatprep.mubr.msk.bf16.mxu1 %vm294_vm0, %v1699_v36 }
  0x4e   :  { %1618 = vmatmul.mubr.msk.bf16.gmra.mxu0 %vm294_vm0, %v1700_v37  ;;  %1654 = vmatmul.mubr.msk.bf16.gmra.mxu1 %vm294_vm0, %v1701_v38 }
  0xce   :  { %v1587_v39 = vpop.f32.mrf.mxu0  ;;  %v1623_v41 = vpop.f32.mrf.mxu1 }
  0xcf   :  { %v726_v42 = vmax.f32 %v1587_v39, 0.0  ;;  %v762_v43 = vmax.f32 %v1623_v41, 0.0 }
  0xd0   :  { %v437_v45 = vpop.f32.mrf.mxu0  ;;  %v581_v46 = vpop.f32.mrf.mxu1 }
  0xd1   :  { %v805_v47 = vmul.f32 %v1883_v40, %v726_v42  ;;  %v841_v48 = vmul.f32 %v1883_v40, %v762_v43  ;;  %v724_v49 = vmax.f32 %v437_v45, 0.0  ;;  %v760_v50 = vmax.f32 %v581_v46, 0.0 }
  0xd2   :  { %v1588_v51 = vpop.f32.mrf.mxu0  ;;  %v1624_v52 = vpop.f32.mrf.mxu1 }
  0xd3   :  { %v884_v53 = vadd.f32 %v1888_v44, %v805_v47  ;;  %v920_v54 = vadd.f32 %v1888_v44, %v841_v48  ;;  %v803_v55 = vmul.f32 %v1883_v40, %v724_v49  ;;  %v839_v56 = vmul.f32 %v1883_v40, %v760_v50 }
  0xd4   :  { %v727_v57 = vmax.f32 %v1588_v51, 0.0  ;;  %v763_v58 = vmax.f32 %v1624_v52, 0.0  ;;  %v440_v59 = vpop.f32.mrf.mxu0  ;;  %v584_v60 = vpop.f32.mrf.mxu1 }
  0xd5   :  { %v1470_v61 = vpack.c.bf16 %v884_v53, %v884_v53  ;;  %v1506_v62 = vpack.c.bf16 %v920_v54, %v920_v54  ;;  %v882_v63 = vadd.f32 %v1888_v44, %v803_v55  ;;  %v918_v0 = vadd.f32 %v1888_v44, %v839_v56 }
  0xd6   :  { %v806_v1 = vmul.f32 %v1883_v40, %v727_v57  ;;  %v842_v2 = vmul.f32 %v1883_v40, %v763_v58  ;;  %v725_v3 = vmax.f32 %v440_v59, 0.0  ;;  %v761_v4 = vmax.f32 %v584_v60, 0.0  ;;  %v1591_v5 = vpop.f32.mrf.mxu0  ;;  %v1627_v6 = vpop.f32.mrf.mxu1 }
  0xd7   :  { %1245 = vst.msk [vmem:[%s2326_s4 + $0x8] sm:$0xf] %vm1242_vm1, %v1470_v61  ;;  %1281 = vst.msk [vmem:[%s2326_s4 + $0x98] sm:$0xf] %vm1242_vm1, %v1506_v62  ;;  %v1468_v7 = vpack.c.bf16 %v882_v63, %v882_v63  ;;  %v1504_v8 = vpack.c.bf16 %v918_v0, %v918_v0  ;;  %v730_v9 = vmax.f32 %v1591_v5, 0.0  ;;  %v766_v10 = vmax.f32 %v1627_v6, 0.0 }
  0xd8   :  { %v885_v11 = vadd.f32 %v1888_v44, %v806_v1  ;;  %v921_v12 = vadd.f32 %v1888_v44, %v842_v2  ;;  %v804_v13 = vmul.f32 %v1883_v40, %v725_v3  ;;  %v840_v14 = vmul.f32 %v1883_v40, %v761_v4  ;;  %v453_v15 = vpop.f32.mrf.mxu0  ;;  %v597_v16 = vpop.f32.mrf.mxu1 }
  0xd9   :  { %1243 = vst.msk [vmem:[%s2326_s4] sm:$0xf] %vm1242_vm1, %v1468_v7  ;;  %1279 = vst.msk [vmem:[%s2326_s4 + $0x90] sm:$0xf] %vm1242_vm1, %v1504_v8  ;;  %v809_v17 = vmul.f32 %v1883_v40, %v730_v9  ;;  %v845_v18 = vmul.f32 %v1883_v40, %v766_v10  ;;  %v728_v19 = vmax.f32 %v453_v15, 0.0  ;;  %v764_v20 = vmax.f32 %v597_v16, 0.0 }
  0xda   :  { %v1471_v21 = vpack.c.bf16 %v885_v11, %v885_v11  ;;  %v1507_v22 = vpack.c.bf16 %v921_v12, %v921_v12  ;;  %v883_v23 = vadd.f32 %v1888_v44, %v804_v13  ;;  %v919_v24 = vadd.f32 %v1888_v44, %v840_v14  ;;  %v1592_v25 = vpop.f32.mrf.mxu0  ;;  %v1628_v26 = vpop.f32.mrf.mxu1 }
  0xdb   :  { %v888_v27 = vadd.f32 %v1888_v44, %v809_v17  ;;  %v924_v28 = vadd.f32 %v1888_v44, %v845_v18  ;;  %v807_v29 = vmul.f32 %v1883_v40, %v728_v19  ;;  %v843_v30 = vmul.f32 %v1883_v40, %v764_v20 }
  0xdc   :  { %1246 = vst.msk [vmem:[%s2326_s4 + $0xc] sm:$0xf] %vm1242_vm1, %v1471_v21  ;;  %1282 = vst.msk [vmem:[%s2326_s4 + $0x9c] sm:$0xf] %vm1242_vm1, %v1507_v22  ;;  %v1469_v31 = vpack.c.bf16 %v883_v23, %v883_v23  ;;  %v1505_v32 = vpack.c.bf16 %v919_v24, %v919_v24  ;;  %v731_v33 = vmax.f32 %v1592_v25, 0.0  ;;  %v767_v34 = vmax.f32 %v1628_v26, 0.0  ;;  %v456_v35 = vpop.f32.mrf.mxu0  ;;  %v600_v36 = vpop.f32.mrf.mxu1 }
  0xdd   :  { %v1474_v37 = vpack.c.bf16 %v888_v27, %v888_v27  ;;  %v1510_v38 = vpack.c.bf16 %v924_v28, %v924_v28  ;;  %v886_v39 = vadd.f32 %v1888_v44, %v807_v29  ;;  %v922_v41 = vadd.f32 %v1888_v44, %v843_v30 }
  0xde   :  { %1244 = vst.msk [vmem:[%s2326_s4 + $0x4] sm:$0xf] %vm1242_vm1, %v1469_v31  ;;  %1280 = vst.msk [vmem:[%s2326_s4 + $0x94] sm:$0xf] %vm1242_vm1, %v1505_v32  ;;  %v810_v42 = vmul.f32 %v1883_v40, %v731_v33  ;;  %v846_v43 = vmul.f32 %v1883_v40, %v767_v34  ;;  %v729_v45 = vmax.f32 %v456_v35, 0.0  ;;  %v765_v46 = vmax.f32 %v600_v36, 0.0  ;;  %v1595_v47 = vpop.f32.mrf.mxu0  ;;  %v1631_v48 = vpop.f32.mrf.mxu1 }
  0xdf   :  { %1249 = vst.msk [vmem:[%s2326_s4 + $0x18] sm:$0xf] %vm1242_vm1, %v1474_v37  ;;  %1285 = vst.msk [vmem:[%s2326_s4 + $0xa8] sm:$0xf] %vm1242_vm1, %v1510_v38  ;;  %v1472_v49 = vpack.c.bf16 %v886_v39, %v886_v39  ;;  %v1508_v50 = vpack.c.bf16 %v922_v41, %v922_v41  ;;  %v734_v51 = vmax.f32 %v1595_v47, 0.0  ;;  %v770_v52 = vmax.f32 %v1631_v48, 0.0 }
  0xe0   :  { %v889_v53 = vadd.f32 %v1888_v44, %v810_v42  ;;  %v925_v54 = vadd.f32 %v1888_v44, %v846_v43  ;;  %v808_v55 = vmul.f32 %v1883_v40, %v729_v45  ;;  %v844_v56 = vmul.f32 %v1883_v40, %v765_v46  ;;  %v469_v57 = vpop.f32.mrf.mxu0  ;;  %v613_v58 = vpop.f32.mrf.mxu1 }
  0xe1   :  { %1247 = vst.msk [vmem:[%s2326_s4 + $0x10] sm:$0xf] %vm1242_vm1, %v1472_v49  ;;  %1283 = vst.msk [vmem:[%s2326_s4 + $0xa0] sm:$0xf] %vm1242_vm1, %v1508_v50  ;;  %v813_v59 = vmul.f32 %v1883_v40, %v734_v51  ;;  %v849_v60 = vmul.f32 %v1883_v40, %v770_v52  ;;  %v732_v61 = vmax.f32 %v469_v57, 0.0  ;;  %v768_v62 = vmax.f32 %v613_v58, 0.0 }
  0xe2   :  { %v1475_v63 = vpack.c.bf16 %v889_v53, %v889_v53  ;;  %v1511_v0 = vpack.c.bf16 %v925_v54, %v925_v54  ;;  %v887_v1 = vadd.f32 %v1888_v44, %v808_v55  ;;  %v923_v2 = vadd.f32 %v1888_v44, %v844_v56  ;;  %v1596_v3 = vpop.f32.mrf.mxu0  ;;  %v1632_v4 = vpop.f32.mrf.mxu1 }
  0xe3   :  { %v892_v5 = vadd.f32 %v1888_v44, %v813_v59  ;;  %v928_v6 = vadd.f32 %v1888_v44, %v849_v60  ;;  %v811_v7 = vmul.f32 %v1883_v40, %v732_v61  ;;  %v847_v8 = vmul.f32 %v1883_v40, %v768_v62 }
  0xe4   :  { %1250 = vst.msk [vmem:[%s2326_s4 + $0x1c] sm:$0xf] %vm1242_vm1, %v1475_v63  ;;  %1286 = vst.msk [vmem:[%s2326_s4 + $0xac] sm:$0xf] %vm1242_vm1, %v1511_v0  ;;  %v1473_v9 = vpack.c.bf16 %v887_v1, %v887_v1  ;;  %v1509_v10 = vpack.c.bf16 %v923_v2, %v923_v2  ;;  %v735_v11 = vmax.f32 %v1596_v3, 0.0  ;;  %v771_v12 = vmax.f32 %v1632_v4, 0.0  ;;  %v472_v13 = vpop.f32.mrf.mxu0  ;;  %v616_v14 = vpop.f32.mrf.mxu1 }
  0xe5   :  { %v1478_v15 = vpack.c.bf16 %v892_v5, %v892_v5  ;;  %v1514_v16 = vpack.c.bf16 %v928_v6, %v928_v6  ;;  %v890_v17 = vadd.f32 %v1888_v44, %v811_v7  ;;  %v926_v18 = vadd.f32 %v1888_v44, %v847_v8 }
  0xe6   :  { %1248 = vst.msk [vmem:[%s2326_s4 + $0x14] sm:$0xf] %vm1242_vm1, %v1473_v9  ;;  %1284 = vst.msk [vmem:[%s2326_s4 + $0xa4] sm:$0xf] %vm1242_vm1, %v1509_v10  ;;  %v814_v19 = vmul.f32 %v1883_v40, %v735_v11  ;;  %v850_v20 = vmul.f32 %v1883_v40, %v771_v12  ;;  %v733_v21 = vmax.f32 %v472_v13, 0.0  ;;  %v769_v22 = vmax.f32 %v616_v14, 0.0  ;;  %v1599_v23 = vpop.f32.mrf.mxu0  ;;  %v1635_v24 = vpop.f32.mrf.mxu1 }
  0xe7   :  { %1253 = vst.msk [vmem:[%s2326_s4 + $0x28] sm:$0xf] %vm1242_vm1, %v1478_v15  ;;  %1289 = vst.msk [vmem:[%s2326_s4 + $0xb8] sm:$0xf] %vm1242_vm1, %v1514_v16  ;;  %v1476_v25 = vpack.c.bf16 %v890_v17, %v890_v17  ;;  %v1512_v26 = vpack.c.bf16 %v926_v18, %v926_v18  ;;  %v738_v27 = vmax.f32 %v1599_v23, 0.0  ;;  %v774_v28 = vmax.f32 %v1635_v24, 0.0 }
  0xe8   :  { %v893_v29 = vadd.f32 %v1888_v44, %v814_v19  ;;  %v929_v30 = vadd.f32 %v1888_v44, %v850_v20  ;;  %v812_v31 = vmul.f32 %v1883_v40, %v733_v21  ;;  %v848_v32 = vmul.f32 %v1883_v40, %v769_v22  ;;  %v485_v33 = vpop.f32.mrf.mxu0  ;;  %v629_v34 = vpop.f32.mrf.mxu1 }
  0xe9   :  { %1251 = vst.msk [vmem:[%s2326_s4 + $0x20] sm:$0xf] %vm1242_vm1, %v1476_v25  ;;  %1287 = vst.msk [vmem:[%s2326_s4 + $0xb0] sm:$0xf] %vm1242_vm1, %v1512_v26  ;;  %v817_v35 = vmul.f32 %v1883_v40, %v738_v27  ;;  %v853_v36 = vmul.f32 %v1883_v40, %v774_v28  ;;  %v736_v37 = vmax.f32 %v485_v33, 0.0  ;;  %v772_v38 = vmax.f32 %v629_v34, 0.0 }
  0xea   :  { %v1479_v39 = vpack.c.bf16 %v893_v29, %v893_v29  ;;  %v1515_v41 = vpack.c.bf16 %v929_v30, %v929_v30  ;;  %v891_v42 = vadd.f32 %v1888_v44, %v812_v31  ;;  %v927_v43 = vadd.f32 %v1888_v44, %v848_v32  ;;  %v1600_v45 = vpop.f32.mrf.mxu0  ;;  %v1636_v46 = vpop.f32.mrf.mxu1 }
  0xeb   :  { %v896_v47 = vadd.f32 %v1888_v44, %v817_v35  ;;  %v932_v48 = vadd.f32 %v1888_v44, %v853_v36  ;;  %v815_v49 = vmul.f32 %v1883_v40, %v736_v37  ;;  %v851_v50 = vmul.f32 %v1883_v40, %v772_v38 }
  0xec   :  { %1254 = vst.msk [vmem:[%s2326_s4 + $0x2c] sm:$0xf] %vm1242_vm1, %v1479_v39  ;;  %1290 = vst.msk [vmem:[%s2326_s4 + $0xbc] sm:$0xf] %vm1242_vm1, %v1515_v41  ;;  %v1477_v51 = vpack.c.bf16 %v891_v42, %v891_v42  ;;  %v1513_v52 = vpack.c.bf16 %v927_v43, %v927_v43  ;;  %v739_v53 = vmax.f32 %v1600_v45, 0.0  ;;  %v775_v54 = vmax.f32 %v1636_v46, 0.0  ;;  %v488_v55 = vpop.f32.mrf.mxu0  ;;  %v632_v56 = vpop.f32.mrf.mxu1 }
  0xed   :  { %v1482_v57 = vpack.c.bf16 %v896_v47, %v896_v47  ;;  %v1518_v58 = vpack.c.bf16 %v932_v48, %v932_v48  ;;  %v894_v59 = vadd.f32 %v1888_v44, %v815_v49  ;;  %v930_v60 = vadd.f32 %v1888_v44, %v851_v50 }
  0xee   :  { %1252 = vst.msk [vmem:[%s2326_s4 + $0x24] sm:$0xf] %vm1242_vm1, %v1477_v51  ;;  %1288 = vst.msk [vmem:[%s2326_s4 + $0xb4] sm:$0xf] %vm1242_vm1, %v1513_v52  ;;  %v818_v61 = vmul.f32 %v1883_v40, %v739_v53  ;;  %v854_v62 = vmul.f32 %v1883_v40, %v775_v54  ;;  %v737_v63 = vmax.f32 %v488_v55, 0.0  ;;  %v773_v0 = vmax.f32 %v632_v56, 0.0  ;;  %v1603_v1 = vpop.f32.mrf.mxu0  ;;  %v1639_v2 = vpop.f32.mrf.mxu1 }
  0xef   :  { %1257 = vst.msk [vmem:[%s2326_s4 + $0x38] sm:$0xf] %vm1242_vm1, %v1482_v57  ;;  %1293 = vst.msk [vmem:[%s2326_s4 + $0xc8] sm:$0xf] %vm1242_vm1, %v1518_v58  ;;  %v1480_v3 = vpack.c.bf16 %v894_v59, %v894_v59  ;;  %v1516_v4 = vpack.c.bf16 %v930_v60, %v930_v60  ;;  %v742_v5 = vmax.f32 %v1603_v1, 0.0  ;;  %v778_v6 = vmax.f32 %v1639_v2, 0.0 }
  0xf0   :  { %v897_v7 = vadd.f32 %v1888_v44, %v818_v61  ;;  %v933_v8 = vadd.f32 %v1888_v44, %v854_v62  ;;  %v816_v9 = vmul.f32 %v1883_v40, %v737_v63  ;;  %v852_v10 = vmul.f32 %v1883_v40, %v773_v0  ;;  %v501_v11 = vpop.f32.mrf.mxu0  ;;  %v645_v12 = vpop.f32.mrf.mxu1 }
  0xf1   :  { %1255 = vst.msk [vmem:[%s2326_s4 + $0x30] sm:$0xf] %vm1242_vm1, %v1480_v3  ;;  %1291 = vst.msk [vmem:[%s2326_s4 + $0xc0] sm:$0xf] %vm1242_vm1, %v1516_v4  ;;  %v821_v13 = vmul.f32 %v1883_v40, %v742_v5  ;;  %v857_v14 = vmul.f32 %v1883_v40, %v778_v6  ;;  %v740_v15 = vmax.f32 %v501_v11, 0.0  ;;  %v776_v16 = vmax.f32 %v645_v12, 0.0 }
  0xf2   :  { %v1483_v17 = vpack.c.bf16 %v897_v7, %v897_v7  ;;  %v1519_v18 = vpack.c.bf16 %v933_v8, %v933_v8  ;;  %v895_v19 = vadd.f32 %v1888_v44, %v816_v9  ;;  %v931_v20 = vadd.f32 %v1888_v44, %v852_v10  ;;  %v1604_v21 = vpop.f32.mrf.mxu0  ;;  %v1640_v22 = vpop.f32.mrf.mxu1 }
  0xf3   :  { %v900_v23 = vadd.f32 %v1888_v44, %v821_v13  ;;  %v936_v24 = vadd.f32 %v1888_v44, %v857_v14  ;;  %v819_v25 = vmul.f32 %v1883_v40, %v740_v15  ;;  %v855_v26 = vmul.f32 %v1883_v40, %v776_v16 }
  0xf4   :  { %1258 = vst.msk [vmem:[%s2326_s4 + $0x3c] sm:$0xf] %vm1242_vm1, %v1483_v17  ;;  %1294 = vst.msk [vmem:[%s2326_s4 + $0xcc] sm:$0xf] %vm1242_vm1, %v1519_v18  ;;  %v1481_v27 = vpack.c.bf16 %v895_v19, %v895_v19  ;;  %v1517_v28 = vpack.c.bf16 %v931_v20, %v931_v20  ;;  %v743_v29 = vmax.f32 %v1604_v21, 0.0  ;;  %v779_v30 = vmax.f32 %v1640_v22, 0.0  ;;  %v504_v31 = vpop.f32.mrf.mxu0  ;;  %v648_v32 = vpop.f32.mrf.mxu1 }
  0xf5   :  { %v1486_v33 = vpack.c.bf16 %v900_v23, %v900_v23  ;;  %v1522_v34 = vpack.c.bf16 %v936_v24, %v936_v24  ;;  %v898_v35 = vadd.f32 %v1888_v44, %v819_v25  ;;  %v934_v36 = vadd.f32 %v1888_v44, %v855_v26 }
  0xf6   :  { %1256 = vst.msk [vmem:[%s2326_s4 + $0x34] sm:$0xf] %vm1242_vm1, %v1481_v27  ;;  %1292 = vst.msk [vmem:[%s2326_s4 + $0xc4] sm:$0xf] %vm1242_vm1, %v1517_v28  ;;  %v822_v37 = vmul.f32 %v1883_v40, %v743_v29  ;;  %v858_v38 = vmul.f32 %v1883_v40, %v779_v30  ;;  %v741_v39 = vmax.f32 %v504_v31, 0.0  ;;  %v777_v41 = vmax.f32 %v648_v32, 0.0  ;;  %v1607_v42 = vpop.f32.mrf.mxu0  ;;  %v1643_v43 = vpop.f32.mrf.mxu1 }
  0xf7   :  { %1261 = vst.msk [vmem:[%s2326_s4 + $0x48] sm:$0xf] %vm1242_vm1, %v1486_v33  ;;  %1297 = vst.msk [vmem:[%s2326_s4 + $0xd8] sm:$0xf] %vm1242_vm1, %v1522_v34  ;;  %v1484_v45 = vpack.c.bf16 %v898_v35, %v898_v35  ;;  %v1520_v46 = vpack.c.bf16 %v934_v36, %v934_v36  ;;  %v746_v47 = vmax.f32 %v1607_v42, 0.0  ;;  %v782_v48 = vmax.f32 %v1643_v43, 0.0 }
  0xf8   :  { %v901_v49 = vadd.f32 %v1888_v44, %v822_v37  ;;  %v937_v50 = vadd.f32 %v1888_v44, %v858_v38  ;;  %v820_v51 = vmul.f32 %v1883_v40, %v741_v39  ;;  %v856_v52 = vmul.f32 %v1883_v40, %v777_v41  ;;  %v517_v53 = vpop.f32.mrf.mxu0  ;;  %v661_v54 = vpop.f32.mrf.mxu1 }
  0xf9   :  { %1259 = vst.msk [vmem:[%s2326_s4 + $0x40] sm:$0xf] %vm1242_vm1, %v1484_v45  ;;  %1295 = vst.msk [vmem:[%s2326_s4 + $0xd0] sm:$0xf] %vm1242_vm1, %v1520_v46  ;;  %v825_v55 = vmul.f32 %v1883_v40, %v746_v47  ;;  %v861_v56 = vmul.f32 %v1883_v40, %v782_v48  ;;  %v744_v57 = vmax.f32 %v517_v53, 0.0  ;;  %v780_v58 = vmax.f32 %v661_v54, 0.0 }
  0xfa   :  { %v1487_v59 = vpack.c.bf16 %v901_v49, %v901_v49  ;;  %v1523_v60 = vpack.c.bf16 %v937_v50, %v937_v50  ;;  %v899_v61 = vadd.f32 %v1888_v44, %v820_v51  ;;  %v935_v62 = vadd.f32 %v1888_v44, %v856_v52  ;;  %v1608_v63 = vpop.f32.mrf.mxu0  ;;  %v1644_v0 = vpop.f32.mrf.mxu1 }
  0xfb   :  { %v904_v1 = vadd.f32 %v1888_v44, %v825_v55  ;;  %v940_v2 = vadd.f32 %v1888_v44, %v861_v56  ;;  %v823_v3 = vmul.f32 %v1883_v40, %v744_v57  ;;  %v859_v4 = vmul.f32 %v1883_v40, %v780_v58 }
  0xfc   :  { %1262 = vst.msk [vmem:[%s2326_s4 + $0x4c] sm:$0xf] %vm1242_vm1, %v1487_v59  ;;  %1298 = vst.msk [vmem:[%s2326_s4 + $0xdc] sm:$0xf] %vm1242_vm1, %v1523_v60  ;;  %v1485_v5 = vpack.c.bf16 %v899_v61, %v899_v61  ;;  %v1521_v6 = vpack.c.bf16 %v935_v62, %v935_v62  ;;  %v747_v7 = vmax.f32 %v1608_v63, 0.0  ;;  %v783_v8 = vmax.f32 %v1644_v0, 0.0  ;;  %v520_v9 = vpop.f32.mrf.mxu0  ;;  %v664_v10 = vpop.f32.mrf.mxu1 }
  0xfd   :  { %v1490_v11 = vpack.c.bf16 %v904_v1, %v904_v1  ;;  %v1526_v12 = vpack.c.bf16 %v940_v2, %v940_v2  ;;  %v902_v13 = vadd.f32 %v1888_v44, %v823_v3  ;;  %v938_v14 = vadd.f32 %v1888_v44, %v859_v4 }
  0xfe   :  { %1260 = vst.msk [vmem:[%s2326_s4 + $0x44] sm:$0xf] %vm1242_vm1, %v1485_v5  ;;  %1296 = vst.msk [vmem:[%s2326_s4 + $0xd4] sm:$0xf] %vm1242_vm1, %v1521_v6  ;;  %v826_v15 = vmul.f32 %v1883_v40, %v747_v7  ;;  %v862_v16 = vmul.f32 %v1883_v40, %v783_v8  ;;  %v745_v17 = vmax.f32 %v520_v9, 0.0  ;;  %v781_v18 = vmax.f32 %v664_v10, 0.0  ;;  %v1611_v19 = vpop.f32.mrf.mxu0  ;;  %v1647_v20 = vpop.f32.mrf.mxu1 }
  0xff   :  { %1265 = vst.msk [vmem:[%s2326_s4 + $0x58] sm:$0xf] %vm1242_vm1, %v1490_v11  ;;  %1301 = vst.msk [vmem:[%s2326_s4 + $0xe8] sm:$0xf] %vm1242_vm1, %v1526_v12  ;;  %v1488_v21 = vpack.c.bf16 %v902_v13, %v902_v13  ;;  %v1524_v22 = vpack.c.bf16 %v938_v14, %v938_v14  ;;  %v750_v23 = vmax.f32 %v1611_v19, 0.0  ;;  %v786_v24 = vmax.f32 %v1647_v20, 0.0 }
 0x100   :  { %v905_v25 = vadd.f32 %v1888_v44, %v826_v15  ;;  %v941_v26 = vadd.f32 %v1888_v44, %v862_v16  ;;  %v824_v27 = vmul.f32 %v1883_v40, %v745_v17  ;;  %v860_v28 = vmul.f32 %v1883_v40, %v781_v18  ;;  %v533_v29 = vpop.f32.mrf.mxu0  ;;  %v677_v30 = vpop.f32.mrf.mxu1 }
 0x101   :  { %1263 = vst.msk [vmem:[%s2326_s4 + $0x50] sm:$0xf] %vm1242_vm1, %v1488_v21  ;;  %1299 = vst.msk [vmem:[%s2326_s4 + $0xe0] sm:$0xf] %vm1242_vm1, %v1524_v22  ;;  %v829_v31 = vmul.f32 %v1883_v40, %v750_v23  ;;  %v865_v32 = vmul.f32 %v1883_v40, %v786_v24  ;;  %v748_v33 = vmax.f32 %v533_v29, 0.0  ;;  %v784_v34 = vmax.f32 %v677_v30, 0.0 }
 0x102   :  { %v1491_v35 = vpack.c.bf16 %v905_v25, %v905_v25  ;;  %v1527_v36 = vpack.c.bf16 %v941_v26, %v941_v26  ;;  %v903_v37 = vadd.f32 %v1888_v44, %v824_v27  ;;  %v939_v38 = vadd.f32 %v1888_v44, %v860_v28  ;;  %v1612_v39 = vpop.f32.mrf.mxu0  ;;  %v1648_v41 = vpop.f32.mrf.mxu1 }
 0x103   :  { %v908_v42 = vadd.f32 %v1888_v44, %v829_v31  ;;  %v944_v43 = vadd.f32 %v1888_v44, %v865_v32  ;;  %v827_v45 = vmul.f32 %v1883_v40, %v748_v33  ;;  %v863_v46 = vmul.f32 %v1883_v40, %v784_v34 }
 0x104   :  { %1266 = vst.msk [vmem:[%s2326_s4 + $0x5c] sm:$0xf] %vm1242_vm1, %v1491_v35  ;;  %1302 = vst.msk [vmem:[%s2326_s4 + $0xec] sm:$0xf] %vm1242_vm1, %v1527_v36  ;;  %v1489_v47 = vpack.c.bf16 %v903_v37, %v903_v37  ;;  %v1525_v48 = vpack.c.bf16 %v939_v38, %v939_v38  ;;  %v751_v49 = vmax.f32 %v1612_v39, 0.0  ;;  %v787_v50 = vmax.f32 %v1648_v41, 0.0  ;;  %v536_v51 = vpop.f32.mrf.mxu0  ;;  %v680_v52 = vpop.f32.mrf.mxu1 }
 0x105   :  { %v1494_v53 = vpack.c.bf16 %v908_v42, %v908_v42  ;;  %v1530_v54 = vpack.c.bf16 %v944_v43, %v944_v43  ;;  %v906_v55 = vadd.f32 %v1888_v44, %v827_v45  ;;  %v942_v56 = vadd.f32 %v1888_v44, %v863_v46 }
 0x106   :  { %1264 = vst.msk [vmem:[%s2326_s4 + $0x54] sm:$0xf] %vm1242_vm1, %v1489_v47  ;;  %1300 = vst.msk [vmem:[%s2326_s4 + $0xe4] sm:$0xf] %vm1242_vm1, %v1525_v48  ;;  %v830_v57 = vmul.f32 %v1883_v40, %v751_v49  ;;  %v866_v58 = vmul.f32 %v1883_v40, %v787_v50  ;;  %v749_v59 = vmax.f32 %v536_v51, 0.0  ;;  %v785_v60 = vmax.f32 %v680_v52, 0.0  ;;  %v1615_v61 = vpop.f32.mrf.mxu0  ;;  %v1651_v62 = vpop.f32.mrf.mxu1 }
 0x107   :  { %1269 = vst.msk [vmem:[%s2326_s4 + $0x68] sm:$0xf] %vm1242_vm1, %v1494_v53  ;;  %1305 = vst.msk [vmem:[%s2326_s4 + $0xf8] sm:$0xf] %vm1242_vm1, %v1530_v54  ;;  %v1492_v63 = vpack.c.bf16 %v906_v55, %v906_v55  ;;  %v1528_v0 = vpack.c.bf16 %v942_v56, %v942_v56  ;;  %v754_v1 = vmax.f32 %v1615_v61, 0.0  ;;  %v790_v2 = vmax.f32 %v1651_v62, 0.0 }
 0x108   :  { %v909_v3 = vadd.f32 %v1888_v44, %v830_v57  ;;  %v945_v4 = vadd.f32 %v1888_v44, %v866_v58  ;;  %v828_v5 = vmul.f32 %v1883_v40, %v749_v59  ;;  %v864_v6 = vmul.f32 %v1883_v40, %v785_v60  ;;  %v549_v7 = vpop.f32.mrf.mxu0  ;;  %v693_v8 = vpop.f32.mrf.mxu1 }
 0x109   :  { %1267 = vst.msk [vmem:[%s2326_s4 + $0x60] sm:$0xf] %vm1242_vm1, %v1492_v63  ;;  %1303 = vst.msk [vmem:[%s2326_s4 + $0xf0] sm:$0xf] %vm1242_vm1, %v1528_v0  ;;  %v833_v9 = vmul.f32 %v1883_v40, %v754_v1  ;;  %v869_v10 = vmul.f32 %v1883_v40, %v790_v2  ;;  %v752_v11 = vmax.f32 %v549_v7, 0.0  ;;  %v788_v12 = vmax.f32 %v693_v8, 0.0 }
 0x10a   :  { %v1495_v13 = vpack.c.bf16 %v909_v3, %v909_v3  ;;  %v1531_v14 = vpack.c.bf16 %v945_v4, %v945_v4  ;;  %v907_v15 = vadd.f32 %v1888_v44, %v828_v5  ;;  %v943_v16 = vadd.f32 %v1888_v44, %v864_v6  ;;  %v1616_v17 = vpop.f32.mrf.mxu0  ;;  %v1652_v18 = vpop.f32.mrf.mxu1 }
 0x10b   :  { %v912_v19 = vadd.f32 %v1888_v44, %v833_v9  ;;  %v948_v20 = vadd.f32 %v1888_v44, %v869_v10  ;;  %v831_v21 = vmul.f32 %v1883_v40, %v752_v11  ;;  %v867_v22 = vmul.f32 %v1883_v40, %v788_v12 }
 0x10c   :  { %1270 = vst.msk [vmem:[%s2326_s4 + $0x6c] sm:$0xf] %vm1242_vm1, %v1495_v13  ;;  %1306 = vst.msk [vmem:[%s2326_s4 + $0xfc] sm:$0xf] %vm1242_vm1, %v1531_v14  ;;  %v1493_v23 = vpack.c.bf16 %v907_v15, %v907_v15  ;;  %v1529_v24 = vpack.c.bf16 %v943_v16, %v943_v16  ;;  %v755_v25 = vmax.f32 %v1616_v17, 0.0  ;;  %v791_v26 = vmax.f32 %v1652_v18, 0.0  ;;  %v552_v27 = vpop.f32.mrf.mxu0  ;;  %v696_v28 = vpop.f32.mrf.mxu1 }
 0x10d   :  { %v1498_v29 = vpack.c.bf16 %v912_v19, %v912_v19  ;;  %v1534_v30 = vpack.c.bf16 %v948_v20, %v948_v20  ;;  %v910_v31 = vadd.f32 %v1888_v44, %v831_v21  ;;  %v946_v32 = vadd.f32 %v1888_v44, %v867_v22 }
 0x10e   :  { %1268 = vst.msk [vmem:[%s2326_s4 + $0x64] sm:$0xf] %vm1242_vm1, %v1493_v23  ;;  %1304 = vst.msk [vmem:[%s2326_s4 + $0xf4] sm:$0xf] %vm1242_vm1, %v1529_v24  ;;  %v834_v33 = vmul.f32 %v1883_v40, %v755_v25  ;;  %v870_v34 = vmul.f32 %v1883_v40, %v791_v26  ;;  %v753_v35 = vmax.f32 %v552_v27, 0.0  ;;  %v789_v36 = vmax.f32 %v696_v28, 0.0  ;;  %v1619_v37 = vpop.f32.mrf.mxu0  ;;  %v1655_v38 = vpop.f32.mrf.mxu1 }
 0x10f   :  { %1273 = vst.msk [vmem:[%s2326_s4 + $0x78] sm:$0xf] %vm1242_vm1, %v1498_v29  ;;  %1309 = vst.msk [vmem:[%s2326_s4 + $0x108] sm:$0xf] %vm1242_vm1, %v1534_v30  ;;  %v1496_v39 = vpack.c.bf16 %v910_v31, %v910_v31  ;;  %v1532_v41 = vpack.c.bf16 %v946_v32, %v946_v32  ;;  %v758_v42 = vmax.f32 %v1619_v37, 0.0  ;;  %v794_v43 = vmax.f32 %v1655_v38, 0.0 }
 0x110   :  { %v913_v45 = vadd.f32 %v1888_v44, %v834_v33  ;;  %v949_v46 = vadd.f32 %v1888_v44, %v870_v34  ;;  %v832_v47 = vmul.f32 %v1883_v40, %v753_v35  ;;  %v868_v48 = vmul.f32 %v1883_v40, %v789_v36  ;;  %v565_v49 = vpop.f32.mrf.mxu0  ;;  %v709_v50 = vpop.f32.mrf.mxu1 }
 0x111   :  { %1271 = vst.msk [vmem:[%s2326_s4 + $0x70] sm:$0xf] %vm1242_vm1, %v1496_v39  ;;  %1307 = vst.msk [vmem:[%s2326_s4 + $0x100] sm:$0xf] %vm1242_vm1, %v1532_v41  ;;  %v837_v51 = vmul.f32 %v1883_v40, %v758_v42  ;;  %v873_v52 = vmul.f32 %v1883_v40, %v794_v43  ;;  %v756_v53 = vmax.f32 %v565_v49, 0.0  ;;  %v792_v54 = vmax.f32 %v709_v50, 0.0 }
 0x112   :  { %v1499_v55 = vpack.c.bf16 %v913_v45, %v913_v45  ;;  %v1535_v56 = vpack.c.bf16 %v949_v46, %v949_v46  ;;  %v911_v57 = vadd.f32 %v1888_v44, %v832_v47  ;;  %v947_v58 = vadd.f32 %v1888_v44, %v868_v48  ;;  %v1620_v59 = vpop.f32.mrf.mxu0  ;;  %v1656_v60 = vpop.f32.mrf.mxu1 }
 0x113   :  { %v916_v61 = vadd.f32 %v1888_v44, %v837_v51  ;;  %v952_v62 = vadd.f32 %v1888_v44, %v873_v52  ;;  %v835_v63 = vmul.f32 %v1883_v40, %v756_v53  ;;  %v871_v0 = vmul.f32 %v1883_v40, %v792_v54 }
 0x114   :  { %1274 = vst.msk [vmem:[%s2326_s4 + $0x7c] sm:$0xf] %vm1242_vm1, %v1499_v55  ;;  %1310 = vst.msk [vmem:[%s2326_s4 + $0x10c] sm:$0xf] %vm1242_vm1, %v1535_v56  ;;  %v1497_v1 = vpack.c.bf16 %v911_v57, %v911_v57  ;;  %v1533_v2 = vpack.c.bf16 %v947_v58, %v947_v58  ;;  %v759_v3 = vmax.f32 %v1620_v59, 0.0  ;;  %v795_v4 = vmax.f32 %v1656_v60, 0.0  ;;  %v568_v5 = vpop.f32.mrf.mxu0  ;;  %v712_v6 = vpop.f32.mrf.mxu1 }
 0x115   :  { %v1502_v7 = vpack.c.bf16 %v916_v61, %v916_v61  ;;  %v1538_v8 = vpack.c.bf16 %v952_v62, %v952_v62  ;;  %v914_v9 = vadd.f32 %v1888_v44, %v835_v63  ;;  %v950_v10 = vadd.f32 %v1888_v44, %v871_v0 }
 0x116   :  { %1272 = vst.msk [vmem:[%s2326_s4 + $0x74] sm:$0xf] %vm1242_vm1, %v1497_v1  ;;  %1308 = vst.msk [vmem:[%s2326_s4 + $0x104] sm:$0xf] %vm1242_vm1, %v1533_v2  ;;  %v838_v11 = vmul.f32 %v1883_v40, %v759_v3  ;;  %v874_v12 = vmul.f32 %v1883_v40, %v795_v4  ;;  %v757_v13 = vmax.f32 %v568_v5, 0.0  ;;  %v793_v14 = vmax.f32 %v712_v6, 0.0 }
 0x117   :  { %1277 = vst.msk [vmem:[%s2326_s4 + $0x88] sm:$0xf] %vm1242_vm1, %v1502_v7  ;;  %1313 = vst.msk [vmem:[%s2326_s4 + $0x118] sm:$0xf] %vm1242_vm1, %v1538_v8  ;;  %v1500_v15 = vpack.c.bf16 %v914_v9, %v914_v9  ;;  %v1536_v16 = vpack.c.bf16 %v950_v10, %v950_v10 }
 0x118   :  { %v917_v17 = vadd.f32 %v1888_v44, %v838_v11  ;;  %v953_v18 = vadd.f32 %v1888_v44, %v874_v12  ;;  %v836_v19 = vmul.f32 %v1883_v40, %v757_v13  ;;  %v872_v20 = vmul.f32 %v1883_v40, %v793_v14 }
 0x119   :  { %1275 = vst.msk [vmem:[%s2326_s4 + $0x80] sm:$0xf] %vm1242_vm1, %v1500_v15  ;;  %1311 = vst.msk [vmem:[%s2326_s4 + $0x110] sm:$0xf] %vm1242_vm1, %v1536_v16 }
 0x11a   :  { %v1503_v21 = vpack.c.bf16 %v917_v17, %v917_v17  ;;  %v1539_v22 = vpack.c.bf16 %v953_v18, %v953_v18  ;;  %v915_v23 = vadd.f32 %v1888_v44, %v836_v19  ;;  %v951_v24 = vadd.f32 %v1888_v44, %v872_v20 }
 0x11c   :  { %1278 = vst.msk [vmem:[%s2326_s4 + $0x8c] sm:$0xf] %vm1242_vm1, %v1503_v21  ;;  %1314 = vst.msk [vmem:[%s2326_s4 + $0x11c] sm:$0xf] %vm1242_vm1, %v1539_v22  ;;  %v1501_v40 = vpack.c.bf16 %v915_v23, %v915_v23  ;;  %v1537_v25 = vpack.c.bf16 %v951_v24, %v951_v24 }
 0x11e   :  { %1276 = vst.msk [vmem:[%s2326_s4 + $0x84] sm:$0xf] %vm1242_vm1, %v1501_v40  ;;  %1312 = vst.msk [vmem:[%s2326_s4 + $0x114] sm:$0xf] %vm1242_vm1, %v1537_v25 }

// kernel: lstm_forward.4
= control target key start
LH: loop header
LB: loop body
LE: loop exit
PB: predicated region body
PF: predicated region fallthrough
CT: control target
= control target key end

     0   :  { %vm1450_vm0 = vcmask 392192   ;;  %s2560_s1 = inlined_call_operand.vmem [shape: bf16[1024,48], index: 1, kind: input, shape index: {}]   ;;  %s2561_s0 = inlined_call_operand.vmem [shape: bf16[144,1024], index: 0, kind: input, shape index: {}]   ;;  %s2562_s2 = inlined_call_operand.vmem [shape: f32[1,48], index: 2, kind: input, shape index: {}]   ;;  %s2563_s3 = inlined_call_operand.vmem [shape: f32[1,48], index: 3, kind: input, shape index: {}]   ;;  %s2564_s4 = inlined_call_operand.vmem [shape: f32[144,48], index: 4, kind: output, shape index: {}]  }
   0x1   :  { %v1891_v0 = vld [vmem:[%s2560_s1 + $0x78] sm:$0xff]   ;;  %v1895_v4 = vld [vmem:[%s2560_s1 + $0x70] sm:$0xff]   ;;  %v1899_v8 = vld [vmem:[%s2560_s1 + $0x68] sm:$0xff]  }
   0x2   :  { %v1892_v1 = vld [vmem:[%s2560_s1 + $0xf8] sm:$0xff]   ;;  %1611 = vmatprep.subr.bf16.mxu0 %v1891_v0  ;;  %v1896_v5 = vld [vmem:[%s2560_s1 + $0xf0] sm:$0xff]   ;;  %v1900_v9 = vld [vmem:[%s2560_s1 + $0xe8] sm:$0xff]  }
   0x3   :  { %v1893_v2 = vld [vmem:[%s2560_s1 + $0x38] sm:$0xff]   ;;  %1681 = vmatprep.subr.bf16.mxu1 %v1892_v1  ;;  %v1897_v6 = vld [vmem:[%s2560_s1 + $0x30] sm:$0xff]   ;;  %v1901_v10 = vld [vmem:[%s2560_s1 + $0x28] sm:$0xff]  }
   0x4   :  { %v1894_v3 = vld [vmem:[%s2560_s1 + $0xb8] sm:$0xff]   ;;  %1612 = vmatpush3.bf16.msra.mxu0 %v1893_v2  ;;  %v1898_v7 = vld [vmem:[%s2560_s1 + $0xb0] sm:$0xff]   ;;  %v1902_v11 = vld [vmem:[%s2560_s1 + $0xa8] sm:$0xff]  }
   0x5   :  { %1682 = vmatpush3.bf16.msra.mxu1 %v1894_v3  ;;  %1613 = vmatprep.subr.bf16.mxu0 %v1895_v4  ;;  %v1903_v12 = vld [vmem:[%s2560_s1 + $0x60] sm:$0xff]   ;;  %v1907_v16 = vld [vmem:[%s2560_s1 + $0x58] sm:$0xff]   ;;  %v1911_v20 = vld [vmem:[%s2560_s1 + $0x50] sm:$0xff]  }
   0x6   :  { %1683 = vmatprep.subr.bf16.mxu1 %v1896_v5  ;;  %v1904_v13 = vld [vmem:[%s2560_s1 + $0xe0] sm:$0xff]   ;;  %v1908_v17 = vld [vmem:[%s2560_s1 + $0xd8] sm:$0xff]   ;;  %v1912_v21 = vld [vmem:[%s2560_s1 + $0xd0] sm:$0xff]  }
   0x7   :  { %v1905_v14 = vld [vmem:[%s2560_s1 + $0x20] sm:$0xff]   ;;  %v1909_v18 = vld [vmem:[%s2560_s1 + $0x18] sm:$0xff]   ;;  %v1913_v22 = vld [vmem:[%s2560_s1 + $0x10] sm:$0xff]  }
   0x8   :  { %1614 = vmatpush3.bf16.msra.mxu0 %v1897_v6  ;;  %v1906_v15 = vld [vmem:[%s2560_s1 + $0xa0] sm:$0xff]   ;;  %v1910_v19 = vld [vmem:[%s2560_s1 + $0x98] sm:$0xff]   ;;  %v1914_v23 = vld [vmem:[%s2560_s1 + $0x90] sm:$0xff]  }
   0x9   :  { %1684 = vmatpush3.bf16.msra.mxu1 %v1898_v7  ;;  %1615 = vmatprep.subr.bf16.mxu0 %v1899_v8  ;;  %v1915_v24 = vld [vmem:[%s2560_s1 + $0x48] sm:$0xff]   ;;  %v1919_v28 = vld [vmem:[%s2560_s1 + $0x40] sm:$0xff]   ;;  %v1923_v40 = vld [vmem:[%s2560_s1 + $0x178] sm:$0xff]  }
   0xa   :  { %1685 = vmatprep.subr.bf16.mxu1 %v1900_v9  ;;  %v1916_v25 = vld [vmem:[%s2560_s1 + $0xc8] sm:$0xff]   ;;  %v1920_v29 = vld [vmem:[%s2560_s1 + $0xc0] sm:$0xff]   ;;  %v1924_v41 = vld [vmem:[%s2560_s1 + $0x138] sm:$0xff]  }
   0xb   :  { %v1917_v26 = vld [vmem:[%s2560_s1 + $0x8] sm:$0xff]   ;;  %v1921_v30 = vld [vmem:[%s2560_s1] sm:$0xff]   ;;  %v1925_v42 = vld [vmem:[%s2560_s1 + $0x1f8] sm:$0xff]  }
   0xc   :  { %1616 = vmatpush3.bf16.msra.mxu0 %v1901_v10  ;;  %v1918_v27 = vld [vmem:[%s2560_s1 + $0x88] sm:$0xff]   ;;  %v1922_v31 = vld [vmem:[%s2560_s1 + $0x80] sm:$0xff]   ;;  %v1926_v43 = vld [vmem:[%s2560_s1 + $0x1b8] sm:$0xff]  }
   0xd   :  { %1686 = vmatpush3.bf16.msra.mxu1 %v1902_v11  ;;  %1617 = vmatprep.subr.bf16.mxu0 %v1903_v12  ;;  %v18_v32 = vld [vmem:[%s2561_s0] sm:$0xff]  ;;  %v19_v34 = vld [vmem:[%s2561_s0 + $0x8] sm:$0xff]  ;;  %v1927_v50 = vld [vmem:[%s2560_s1 + $0x170] sm:$0xff]  }
   0xe   :  { %1687 = vmatprep.subr.bf16.mxu1 %v1904_v13  ;;  %v22_v33 = vld [vmem:[%s2561_s0 + $0x20] sm:$0xff]  ;;  %v23_v37 = vld [vmem:[%s2561_s0 + $0x28] sm:$0xff]  ;;  %v1928_v52 = vld [vmem:[%s2560_s1 + $0x130] sm:$0xff]  }
   0xf   :  { %v1473_v35 = vcombine.low %v18_v32, %v22_v33  ;;  %v1474_v36 = vcombine.high %v18_v32, %v22_v33  ;;  %v1475_v38 = vcombine.low %v19_v34, %v23_v37  ;;  %v1476_v39 = vcombine.high %v19_v34, %v23_v37  ;;  %v26_v44 = vld [vmem:[%s2561_s0 + $0x40] sm:$0xff]  ;;  %v27_v47 = vld [vmem:[%s2561_s0 + $0x48] sm:$0xff]  ;;  %v1929_v54 = vld [vmem:[%s2560_s1 + $0x1f0] sm:$0xff]  }
  0x10   :  { %1618 = vmatpush3.bf16.msra.mxu0 %v1905_v14  ;;  %v30_v45 = vld [vmem:[%s2561_s0 + $0x60] sm:$0xff]  ;;  %v31_v48 = vld [vmem:[%s2561_s0 + $0x68] sm:$0xff]  ;;  %v1930_v55 = vld [vmem:[%s2560_s1 + $0x1b0] sm:$0xff]  }
  0x11   :  { %1688 = vmatpush3.bf16.msra.mxu1 %v1906_v15  ;;  %1619 = vmatprep.subr.bf16.mxu0 %v1907_v16  ;;  %v1482_v46 = vcombine.high %v26_v44, %v30_v45  ;;  %v1484_v49 = vcombine.high %v27_v47, %v31_v48  ;;  %v1481_v51 = vcombine.low %v26_v44, %v30_v45  ;;  %v34_v56 = vld [vmem:[%s2561_s0 + $0x80] sm:$0xff]  ;;  %v35_v58 = vld [vmem:[%s2561_s0 + $0x88] sm:$0xff]  ;;  %v1945_v33 = vld [vmem:[%s2560_s1 + $0x1d0] sm:$0xff]  }
  0x12   :  { %1689 = vmatprep.subr.bf16.mxu1 %v1908_v17  ;;  %994 = vmatprep.mubr.bf16.mxu0 %v1474_v36  ;;  %v1483_v53 = vcombine.low %v27_v47, %v31_v48  ;;  %v38_v57 = vld [vmem:[%s2561_s0 + $0xa0] sm:$0xff]  ;;  %v39_v59 = vld [vmem:[%s2561_s0 + $0xa8] sm:$0xff]  ;;  %v1946_v36 = vld [vmem:[%s2560_s1 + $0x190] sm:$0xff]  }
  0x13   :  { %1099 = vmatprep.mubr.bf16.mxu1 %v1476_v39  ;;  %v1490_v60 = vcombine.high %v34_v56, %v38_v57  ;;  %v1492_v61 = vcombine.high %v35_v58, %v39_v59  ;;  %v1931_v62 = vld [vmem:[%s2560_s1 + $0x168] sm:$0xff]   ;;  %v1489_v2 = vcombine.low %v34_v56, %v38_v57  ;;  %v42_v3 = vld [vmem:[%s2561_s0 + $0xc0] sm:$0xff]  ;;  %v1491_v6 = vcombine.low %v35_v58, %v39_v59 }
  0x14   :  { %1620 = vmatpush3.bf16.msra.mxu0 %v1909_v18  ;;  %v1932_v63 = vld [vmem:[%s2560_s1 + $0x128] sm:$0xff]   ;;  %v46_v4 = vld [vmem:[%s2561_s0 + $0xe0] sm:$0xff]  ;;  %v1939_v18 = vld [vmem:[%s2560_s1 + $0x158] sm:$0xff]  }
  0x15   :  { %1690 = vmatpush3.bf16.msra.mxu1 %v1910_v19  ;;  %1621 = vmatprep.subr.bf16.mxu0 %v1911_v20  ;;  %v1933_v0 = vld [vmem:[%s2560_s1 + $0x1e8] sm:$0xff]   ;;  %v1498_v7 = vcombine.high %v42_v3, %v46_v4  ;;  %v1935_v10 = vld [vmem:[%s2560_s1 + $0x160] sm:$0xff]   ;;  %v1497_v19 = vcombine.low %v42_v3, %v46_v4  ;;  %v1940_v20 = vld [vmem:[%s2560_s1 + $0x118] sm:$0xff]  }
  0x16   :  { %1691 = vmatprep.subr.bf16.mxu1 %v1912_v21  ;;  %v1934_v1 = vld [vmem:[%s2560_s1 + $0x1a8] sm:$0xff]   ;;  %v1936_v11 = vld [vmem:[%s2560_s1 + $0x120] sm:$0xff]  }
  0x17   :  { %v43_v5 = vld [vmem:[%s2561_s0 + $0xc8] sm:$0xff]  ;;  %v1937_v12 = vld [vmem:[%s2560_s1 + $0x1e0] sm:$0xff]  }
  0x18   :  { %1622 = vmatpush3.bf16.msra.mxu0 %v1913_v22  ;;  %v47_v8 = vld [vmem:[%s2561_s0 + $0xe8] sm:$0xff]  ;;  %v1938_v13 = vld [vmem:[%s2560_s1 + $0x1a0] sm:$0xff]  }
  0x19   :  { %1692 = vmatpush3.bf16.msra.mxu1 %v1914_v23  ;;  %1623 = vmatprep.subr.bf16.mxu0 %v1915_v24  ;;  %v1500_v9 = vcombine.high %v43_v5, %v47_v8  ;;  %v50_v14 = vld [vmem:[%s2561_s0 + $0x100] sm:$0xff]  ;;  %v51_v16 = vld [vmem:[%s2561_s0 + $0x108] sm:$0xff]  ;;  %v1499_v21 = vcombine.low %v43_v5, %v47_v8  ;;  %v1941_v23 = vld [vmem:[%s2560_s1 + $0x1d8] sm:$0xff]  }
  0x1a   :  { %1693 = vmatprep.subr.bf16.mxu1 %v1916_v25  ;;  %v54_v15 = vld [vmem:[%s2561_s0 + $0x120] sm:$0xff]  ;;  %v55_v17 = vld [vmem:[%s2561_s0 + $0x128] sm:$0xff]  ;;  %v1942_v25 = vld [vmem:[%s2560_s1 + $0x198] sm:$0xff]  }
  0x1b   :  { %v1506_v22 = vcombine.high %v50_v14, %v54_v15  ;;  %v1508_v24 = vcombine.high %v51_v16, %v55_v17  ;;  %v1505_v32 = vcombine.low %v50_v14, %v54_v15  ;;  %v1507_v34 = vcombine.low %v51_v16, %v55_v17  ;;  %v66_v39 = vld [vmem:[%s2561_s0 + $0x180] sm:$0xff]  ;;  %v67_v44 = vld [vmem:[%s2561_s0 + $0x188] sm:$0xff]  ;;  %v21_v8 = vld [vmem:[%s2561_s0 + $0x18] sm:$0xff] }
  0x1c   :  { %1624 = vmatpush3.bf16.msra.mxu0 %v1917_v26  ;;  %v1943_v26 = vld [vmem:[%s2560_s1 + $0x150] sm:$0xff]   ;;  %v71_v45 = vld [vmem:[%s2561_s0 + $0x1a8] sm:$0xff]  ;;  %v1951_v47 = vld [vmem:[%s2560_s1 + $0x140] sm:$0xff]  }
  0x1d   :  { %1694 = vmatpush3.bf16.msra.mxu1 %v1918_v27  ;;  %1625 = vmatprep.subr.bf16.mxu0 %v1919_v28  ;;  %v1944_v27 = vld [vmem:[%s2560_s1 + $0x110] sm:$0xff]   ;;  %v58_v28 = vld [vmem:[%s2561_s0 + $0x140] sm:$0xff]  ;;  %v75_v56 = vld [vmem:[%s2561_s0 + $0x1c8] sm:$0xff]  ;;  %v1523_v59 = vcombine.low %v67_v44, %v71_v45 }
  0x1e   :  { %1695 = vmatprep.subr.bf16.mxu1 %v1920_v29  ;;  %v62_v29 = vld [vmem:[%s2561_s0 + $0x160] sm:$0xff]  ;;  %v79_v57 = vld [vmem:[%s2561_s0 + $0x1e8] sm:$0xff]  ;;  %v28_v14 = vld [vmem:[%s2561_s0 + $0x50] sm:$0xff] }
  0x1f   :  { %v1531_v3 = vcombine.low %v75_v56, %v79_v57  ;;  %v32_v15 = vld [vmem:[%s2561_s0 + $0x70] sm:$0xff]  ;;  %v29_v16 = vld [vmem:[%s2561_s0 + $0x58] sm:$0xff] }
  0x20   :  { %1626 = vmatpush3.bf16.msra.mxu0 %v1921_v30  ;;  %v59_v30 = vld [vmem:[%s2561_s0 + $0x148] sm:$0xff]  ;;  %v33_v17 = vld [vmem:[%s2561_s0 + $0x78] sm:$0xff] }
  0x21   :  { %1696 = vmatpush3.bf16.msra.mxu1 %v1922_v31  ;;  %1751 = vmatprep.subr.bf16.mxu0 %v1923_v40  ;;  %v63_v31 = vld [vmem:[%s2561_s0 + $0x168] sm:$0xff] }
  0x22   :  { %1821 = vmatprep.subr.bf16.mxu1 %v1925_v42  ;;  %v1516_v37 = vcombine.high %v59_v30, %v63_v31  ;;  %v1948_v40 = vld [vmem:[%s2560_s1 + $0x108] sm:$0xff]   ;;  %v70_v42 = vld [vmem:[%s2561_s0 + $0x1a0] sm:$0xff]  ;;  %v1515_v48 = vcombine.low %v59_v30, %v63_v31  ;;  %v44_v30 = vld [vmem:[%s2561_s0 + $0xd0] sm:$0xff] }
  0x23   :  { %995 = vmatmul.mubr.bf16.vlgmr.msra.gmra.mxu0 %v1473_v35  ;;  %v1514_v35 = vcombine.high %v58_v28, %v62_v29  ;;  %v1521_v58 = vcombine.low %v66_v39, %v70_v42  ;;  %v48_v31 = vld [vmem:[%s2561_s0 + $0xf0] sm:$0xff] }
  0x24   :  { %1100 = vmatmul.mubr.bf16.vlgmr.msra.gmra.mxu1 %v1475_v38  ;;  %1752 = vmatpush3.bf16.msra.mxu0 %v1924_v41  ;;  %v1947_v38 = vld [vmem:[%s2560_s1 + $0x148] sm:$0xff]  }
  0x25   :  { %1822 = vmatpush3.bf16.msra.mxu1 %v1926_v43  ;;  %1002 = vmatprep.mubr.bf16.mxu0 %v1482_v46  ;;  %v1949_v41 = vld [vmem:[%s2560_s1 + $0x1c8] sm:$0xff]   ;;  %v1513_v46 = vcombine.low %v58_v28, %v62_v29 }
  0x26   :  { %1107 = vmatprep.mubr.bf16.mxu1 %v1484_v49  ;;  %1753 = vmatprep.subr.bf16.mxu0 %v1927_v50  ;;  %v1950_v43 = vld [vmem:[%s2560_s1 + $0x188] sm:$0xff]   ;;  %v1522_v49 = vcombine.high %v66_v39, %v70_v42  ;;  %v1952_v50 = vld [vmem:[%s2560_s1 + $0x100] sm:$0xff]   ;;  %v56_v39 = vld [vmem:[%s2561_s0 + $0x130] sm:$0xff]  ;;  %v1501_v42 = vcombine.low %v44_v30, %v48_v31 }
  0x27   :  { %1823 = vmatprep.subr.bf16.mxu1 %v1929_v54  ;;  %v74_v54 = vld [vmem:[%s2561_s0 + $0x1c0] sm:$0xff] }
  0x28   :  { %1754 = vmatpush3.bf16.msra.mxu0 %v1928_v52  ;;  %v1953_v52 = vld [vmem:[%s2560_s1 + $0x1c0] sm:$0xff]  }
  0x29   :  { %1824 = vmatpush3.bf16.msra.mxu1 %v1930_v55  ;;  %1755 = vmatprep.subr.bf16.mxu0 %v1931_v62  ;;  %v78_v55 = vld [vmem:[%s2561_s0 + $0x1e0] sm:$0xff] }
  0x2a   :  { %1825 = vmatprep.subr.bf16.mxu1 %v1933_v0  ;;  %v82_v62 = vld [vmem:[%s2561_s0 + $0x200] sm:$0xff]  ;;  %v83_v0 = vld [vmem:[%s2561_s0 + $0x208] sm:$0xff] }
  0x2b   :  { %1003 = vmatmul.mubr.bf16.gmra.mxu0 %v1481_v51  ;;  %v1524_v51 = vcombine.high %v67_v44, %v71_v45 }
  0x2c   :  { %1108 = vmatmul.mubr.bf16.gmra.mxu1 %v1483_v53  ;;  %1010 = vmatprep.mubr.bf16.mxu0 %v1490_v60  ;;  %v1954_v53 = vld [vmem:[%s2560_s1 + $0x180] sm:$0xff]   ;;  %v1530_v60 = vcombine.high %v74_v54, %v78_v55 }
  0x2d   :  { %1115 = vmatprep.mubr.bf16.mxu1 %v1492_v61  ;;  %1756 = vmatpush3.bf16.msra.mxu0 %v1932_v63  ;;  %v1532_v61 = vcombine.high %v75_v56, %v79_v57  ;;  %v86_v63 = vld [vmem:[%s2561_s0 + $0x220] sm:$0xff]  ;;  %v69_v56 = vld [vmem:[%s2561_s0 + $0x198] sm:$0xff] }
  0x2e   :  { %1826 = vmatpush3.bf16.msra.mxu1 %v1934_v1  ;;  %1757 = vmatprep.subr.bf16.mxu0 %v1935_v10  ;;  %v87_v1 = vld [vmem:[%s2561_s0 + $0x228] sm:$0xff]  ;;  %v1538_v4 = vcombine.high %v82_v62, %v86_v63  ;;  %v1537_v10 = vcombine.low %v82_v62, %v86_v63  ;;  %v73_v57 = vld [vmem:[%s2561_s0 + $0x1b8] sm:$0xff]  ;;  %v76_v62 = vld [vmem:[%s2561_s0 + $0x1d0] sm:$0xff] }
  0x2f   :  { %1827 = vmatprep.subr.bf16.mxu1 %v1937_v12  ;;  %v1540_v5 = vcombine.high %v83_v0, %v87_v1  ;;  %v80_v63 = vld [vmem:[%s2561_s0 + $0x1f0] sm:$0xff] }
  0x31   :  { %1758 = vmatpush3.bf16.msra.mxu0 %v1936_v11  ;;  %v1539_v11 = vcombine.low %v83_v0, %v87_v1  ;;  %v77_v0 = vld [vmem:[%s2561_s0 + $0x1d8] sm:$0xff] }
  0x32   :  { %1828 = vmatpush3.bf16.msra.mxu1 %v1938_v13  ;;  %1759 = vmatprep.subr.bf16.mxu0 %v1939_v18  ;;  %v81_v1 = vld [vmem:[%s2561_s0 + $0x1f8] sm:$0xff] }
  0x33   :  { %1011 = vmatmul.mubr.bf16.gmra.mxu0 %v1489_v2  ;;  %1829 = vmatprep.subr.bf16.mxu1 %v1941_v23  ;;  %v1529_v2 = vcombine.low %v74_v54, %v78_v55  ;;  %v40_v23 = vld [vmem:[%s2561_s0 + $0xb0] sm:$0xff] }
  0x34   :  { %1116 = vmatmul.mubr.bf16.gmra.mxu1 %v1491_v6  ;;  %1018 = vmatprep.mubr.bf16.mxu0 %v1498_v7  ;;  %v20_v6 = vld [vmem:[%s2561_s0 + $0x10] sm:$0xff] }
  0x35   :  { %1123 = vmatprep.mubr.bf16.mxu1 %v1500_v9  ;;  %1760 = vmatpush3.bf16.msra.mxu0 %v1940_v20  ;;  %v24_v7 = vld [vmem:[%s2561_s0 + $0x30] sm:$0xff]  ;;  %v25_v9 = vld [vmem:[%s2561_s0 + $0x38] sm:$0xff]  ;;  %v1486_v20 = vcombine.high %v28_v14, %v32_v15 }
  0x36   :  { %1830 = vmatpush3.bf16.msra.mxu1 %v1942_v25  ;;  %1761 = vmatprep.subr.bf16.mxu0 %v1943_v26  ;;  %v1478_v12 = vcombine.high %v20_v6, %v24_v7  ;;  %v1480_v13 = vcombine.high %v21_v8, %v25_v9  ;;  %v1477_v18 = vcombine.low %v20_v6, %v24_v7  ;;  %v41_v25 = vld [vmem:[%s2561_s0 + $0xb8] sm:$0xff]  ;;  %v68_v54 = vld [vmem:[%s2561_s0 + $0x190] sm:$0xff] }
  0x37   :  { %1831 = vmatprep.subr.bf16.mxu1 %v1945_v33  ;;  %v1485_v26 = vcombine.low %v28_v14, %v32_v15  ;;  %v49_v33 = vld [vmem:[%s2561_s0 + $0xf8] sm:$0xff]  ;;  %v72_v55 = vld [vmem:[%s2561_s0 + $0x1b0] sm:$0xff] }
  0x38   :  { %v84_v6 = vld [vmem:[%s2561_s0 + $0x210] sm:$0xff] }
  0x39   :  { %1762 = vmatpush3.bf16.msra.mxu0 %v1944_v27  ;;  %v1487_v27 = vcombine.low %v29_v16, %v33_v17  ;;  %v88_v7 = vld [vmem:[%s2561_s0 + $0x230] sm:$0xff] }
  0x3a   :  { %1832 = vmatpush3.bf16.msra.mxu1 %v1946_v36  ;;  %1763 = vmatprep.subr.bf16.mxu0 %v1947_v38  ;;  %v1502_v36 = vcombine.high %v44_v30, %v48_v31  ;;  %v52_v38 = vld [vmem:[%s2561_s0 + $0x110] sm:$0xff]  ;;  %v1541_v14 = vcombine.low %v84_v6, %v88_v7 }
  0x3b   :  { %1019 = vmatmul.mubr.bf16.gmra.mxu0 %v1497_v19  ;;  %1833 = vmatprep.subr.bf16.mxu1 %v1949_v41  ;;  %v1479_v19 = vcombine.low %v21_v8, %v25_v9  ;;  %v57_v41 = vld [vmem:[%s2561_s0 + $0x138] sm:$0xff]  ;;  %v1510_v44 = vcombine.high %v52_v38, %v56_v39 }
  0x3c   :  { %1124 = vmatmul.mubr.bf16.gmra.mxu1 %v1499_v21  ;;  %1026 = vmatprep.mubr.bf16.mxu0 %v1506_v22  ;;  %v1488_v21 = vcombine.high %v29_v16, %v33_v17  ;;  %v36_v22 = vld [vmem:[%s2561_s0 + $0x90] sm:$0xff]  ;;  %v85_v8 = vld [vmem:[%s2561_s0 + $0x218] sm:$0xff] }
  0x3d   :  { %1131 = vmatprep.mubr.bf16.mxu1 %v1508_v24  ;;  %1764 = vmatpush3.bf16.msra.mxu0 %v1948_v40  ;;  %v37_v24 = vld [vmem:[%s2561_s0 + $0x98] sm:$0xff]  ;;  %v1494_v28 = vcombine.high %v36_v22, %v40_v23 }
  0x3e   :  { %1834 = vmatpush3.bf16.msra.mxu1 %v1950_v43  ;;  %1765 = vmatprep.subr.bf16.mxu0 %v1951_v47  ;;  %v1496_v29 = vcombine.high %v37_v24, %v41_v25  ;;  %v53_v40 = vld [vmem:[%s2561_s0 + $0x118] sm:$0xff]  ;;  %v64_v47 = vld [vmem:[%s2561_s0 + $0x170] sm:$0xff] }
  0x3f   :  { %1835 = vmatprep.subr.bf16.mxu1 %v1953_v52  ;;  %v1512_v45 = vcombine.high %v53_v40, %v57_v41  ;;  %v89_v9 = vld [vmem:[%s2561_s0 + $0x238] sm:$0xff] }
  0x40   :  { %v1543_v15 = vcombine.low %v85_v8, %v89_v9 }
  0x41   :  { %1766 = vmatpush3.bf16.msra.mxu0 %v1952_v50  ;;  %v1509_v50 = vcombine.low %v52_v38, %v56_v39 }
  0x42   :  { %1836 = vmatpush3.bf16.msra.mxu1 %v1954_v53 }
  0x43   :  { %1027 = vmatmul.mubr.bf16.gmra.mxu0 %v1505_v32  ;;  %v45_v32 = vld [vmem:[%s2561_s0 + $0xd8] sm:$0xff] }
  0x44   :  { %1132 = vmatmul.mubr.bf16.gmra.mxu1 %v1507_v34  ;;  %1034 = vmatprep.mubr.bf16.mxu0 %v1514_v35  ;;  %v1493_v34 = vcombine.low %v36_v22, %v40_v23  ;;  %v1495_v35 = vcombine.low %v37_v24, %v41_v25  ;;  %v1503_v43 = vcombine.low %v45_v32, %v49_v33 }
  0x45   :  { %1139 = vmatprep.mubr.bf16.mxu1 %v1516_v37  ;;  %v1504_v37 = vcombine.high %v45_v32, %v49_v33 }
  0x4b   :  { %1035 = vmatmul.mubr.bf16.gmra.mxu0 %v1513_v46  ;;  %v60_v46 = vld [vmem:[%s2561_s0 + $0x150] sm:$0xff] }
  0x4c   :  { %1140 = vmatmul.mubr.bf16.gmra.mxu1 %v1515_v48  ;;  %1042 = vmatprep.mubr.bf16.mxu0 %v1522_v49  ;;  %v61_v48 = vld [vmem:[%s2561_s0 + $0x158] sm:$0xff]  ;;  %v1518_v52 = vcombine.high %v60_v46, %v64_v47 }
  0x4d   :  { %1147 = vmatprep.mubr.bf16.mxu1 %v1524_v51  ;;  %v65_v49 = vld [vmem:[%s2561_s0 + $0x178] sm:$0xff]  ;;  %v1511_v51 = vcombine.low %v53_v40, %v57_v41 }
  0x4e   :  { %v1520_v53 = vcombine.high %v61_v48, %v65_v49 }
  0x53   :  { %1043 = vmatmul.mubr.bf16.gmra.mxu0 %v1521_v58  ;;  %v1517_v58 = vcombine.low %v60_v46, %v64_v47 }
  0x54   :  { %1148 = vmatmul.mubr.bf16.gmra.mxu1 %v1523_v59  ;;  %1050 = vmatprep.mubr.bf16.mxu0 %v1530_v60  ;;  %v1519_v59 = vcombine.low %v61_v48, %v65_v49  ;;  %v1526_v60 = vcombine.high %v68_v54, %v72_v55 }
  0x55   :  { %1155 = vmatprep.mubr.bf16.mxu1 %v1532_v61  ;;  %v1528_v61 = vcombine.high %v69_v56, %v73_v57 }
  0x5b   :  { %1051 = vmatmul.mubr.bf16.gmra.mxu0 %v1529_v2  ;;  %v1525_v2 = vcombine.low %v68_v54, %v72_v55 }
  0x5c   :  { %1156 = vmatmul.mubr.bf16.gmra.mxu1 %v1531_v3  ;;  %1058 = vmatprep.mubr.bf16.mxu0 %v1538_v4  ;;  %v1527_v3 = vcombine.low %v69_v56, %v73_v57  ;;  %v1534_v4 = vcombine.high %v76_v62, %v80_v63 }
  0x5d   :  { %1163 = vmatprep.mubr.bf16.mxu1 %v1540_v5  ;;  %v1536_v5 = vcombine.high %v77_v0, %v81_v1 }
  0x63   :  { %1059 = vmatmul.mubr.bf16.gmra.mxu0 %v1537_v10  ;;  %v1533_v10 = vcombine.low %v76_v62, %v80_v63 }
  0x64   :  { %1164 = vmatmul.mubr.bf16.gmra.mxu1 %v1539_v11  ;;  %1204 = vmatprep.mubr.bf16.mxu0 %v1478_v12  ;;  %v1535_v11 = vcombine.low %v77_v0, %v81_v1  ;;  %v1542_v12 = vcombine.high %v84_v6, %v88_v7 }
  0x65   :  { %1309 = vmatprep.mubr.bf16.mxu1 %v1480_v13  ;;  %v1544_v13 = vcombine.high %v85_v8, %v89_v9 }
  0x6b   :  { %1205 = vmatmul.mubr.bf16.vlgmr.msra.gmra.mxu0 %v1477_v18 }
  0x6c   :  { %1310 = vmatmul.mubr.bf16.vlgmr.msra.gmra.mxu1 %v1479_v19  ;;  %1212 = vmatprep.mubr.bf16.mxu0 %v1486_v20 }
  0x6d   :  { %1317 = vmatprep.mubr.bf16.mxu1 %v1488_v21 }
  0x73   :  { %1213 = vmatmul.mubr.bf16.gmra.mxu0 %v1485_v26 }
  0x74   :  { %1318 = vmatmul.mubr.bf16.gmra.mxu1 %v1487_v27  ;;  %1220 = vmatprep.mubr.bf16.mxu0 %v1494_v28 }
  0x75   :  { %1325 = vmatprep.mubr.bf16.mxu1 %v1496_v29 }
  0x7b   :  { %1221 = vmatmul.mubr.bf16.gmra.mxu0 %v1493_v34 }
  0x7c   :  { %1326 = vmatmul.mubr.bf16.gmra.mxu1 %v1495_v35  ;;  %1228 = vmatprep.mubr.bf16.mxu0 %v1502_v36 }
  0x7d   :  { %1333 = vmatprep.mubr.bf16.mxu1 %v1504_v37 }
  0x83   :  { %1229 = vmatmul.mubr.bf16.gmra.mxu0 %v1501_v42 }
  0x84   :  { %1334 = vmatmul.mubr.bf16.gmra.mxu1 %v1503_v43  ;;  %1236 = vmatprep.mubr.bf16.mxu0 %v1510_v44 }
  0x85   :  { %1341 = vmatprep.mubr.bf16.mxu1 %v1512_v45 }
  0x8b   :  { %1237 = vmatmul.mubr.bf16.gmra.mxu0 %v1509_v50 }
  0x8c   :  { %1342 = vmatmul.mubr.bf16.gmra.mxu1 %v1511_v51  ;;  %1244 = vmatprep.mubr.bf16.mxu0 %v1518_v52 }
  0x8d   :  { %1349 = vmatprep.mubr.bf16.mxu1 %v1520_v53 }
  0x93   :  { %1245 = vmatmul.mubr.bf16.gmra.mxu0 %v1517_v58 }
  0x94   :  { %1350 = vmatmul.mubr.bf16.gmra.mxu1 %v1519_v59  ;;  %1252 = vmatprep.mubr.bf16.mxu0 %v1526_v60 }
  0x95   :  { %1357 = vmatprep.mubr.bf16.mxu1 %v1528_v61 }
  0x9b   :  { %1253 = vmatmul.mubr.bf16.gmra.mxu0 %v1525_v2 }
  0x9c   :  { %1358 = vmatmul.mubr.bf16.gmra.mxu1 %v1527_v3  ;;  %1260 = vmatprep.mubr.bf16.mxu0 %v1534_v4 }
  0x9d   :  { %1365 = vmatprep.mubr.bf16.mxu1 %v1536_v5 }
  0xa3   :  { %1261 = vmatmul.mubr.bf16.gmra.mxu0 %v1533_v10 }
  0xa4   :  { %1366 = vmatmul.mubr.bf16.gmra.mxu1 %v1535_v11  ;;  %1268 = vmatprep.mubr.bf16.mxu0 %v1542_v12 }
  0xa5   :  { %1373 = vmatprep.mubr.bf16.mxu1 %v1544_v13 }
  0xab   :  { %1269 = vmatmul.mubr.bf16.gmra.mxu0 %v1541_v14 }
  0xac   :  { %1374 = vmatmul.mubr.bf16.gmra.mxu1 %v1543_v15 }
  0xe3   :  { %v1627_v16 = vpop.f32.mrf.mxu0 }
  0xe4   :  { %v1697_v17 = vpop.f32.mrf.mxu1 }
  0xe5   :  { %v1628_v18 = vpop.f32.mrf.mxu0 }
  0xe6   :  { %v1629_v19 = vadd.f32 %v1628_v18, %v1627_v16  ;;  %v1698_v20 = vpop.f32.mrf.mxu1 }
  0xe7   :  { %v1699_v21 = vadd.f32 %v1698_v20, %v1697_v17  ;;  %v1630_v22 = vpop.f32.mrf.mxu0 }
  0xe8   :  { %v1700_v23 = vpop.f32.mrf.mxu1 }
  0xe9   :  { %v2388_v24 = vadd.f32 %v1699_v21, %v1629_v19  ;;  %v1631_v25 = vpop.f32.mrf.mxu0 }
  0xea   :  { %v1632_v26 = vadd.f32 %v1631_v25, %v1630_v22  ;;  %v1701_v27 = vpop.f32.mrf.mxu1 }
  0xeb   :  { %v1702_v28 = vadd.f32 %v1701_v27, %v1700_v23  ;;  %v1633_v29 = vpop.f32.mrf.mxu0 }
  0xec   :  { %v1703_v30 = vpop.f32.mrf.mxu1 }
  0xed   :  { %v2390_v31 = vadd.f32 %v1702_v28, %v1632_v26  ;;  %v1634_v32 = vpop.f32.mrf.mxu0 }
  0xee   :  { %v1635_v33 = vadd.f32 %v1634_v32, %v1633_v29  ;;  %v1704_v34 = vpop.f32.mrf.mxu1 }
  0xef   :  { %v1705_v35 = vadd.f32 %v1704_v34, %v1703_v30  ;;  %v1636_v36 = vpop.f32.mrf.mxu0 }
  0xf0   :  { %v1706_v37 = vpop.f32.mrf.mxu1 }
  0xf1   :  { %v2392_v38 = vadd.f32 %v1705_v35, %v1635_v33  ;;  %v1637_v39 = vpop.f32.mrf.mxu0 }
  0xf2   :  { %v1638_v40 = vadd.f32 %v1637_v39, %v1636_v36  ;;  %v1707_v41 = vpop.f32.mrf.mxu1 }
  0xf3   :  { %v1708_v42 = vadd.f32 %v1707_v41, %v1706_v37  ;;  %v1639_v43 = vpop.f32.mrf.mxu0 }
  0xf4   :  { %v1709_v44 = vpop.f32.mrf.mxu1 }
  0xf5   :  { %v2394_v45 = vadd.f32 %v1708_v42, %v1638_v40  ;;  %v1640_v46 = vpop.f32.mrf.mxu0 }
  0xf6   :  { %v1641_v47 = vadd.f32 %v1640_v46, %v1639_v43  ;;  %v1710_v48 = vpop.f32.mrf.mxu1 }
  0xf7   :  { %v1711_v49 = vadd.f32 %v1710_v48, %v1709_v44  ;;  %v1642_v50 = vpop.f32.mrf.mxu0 }
  0xf8   :  { %v1712_v51 = vpop.f32.mrf.mxu1 }
  0xf9   :  { %v2396_v52 = vadd.f32 %v1711_v49, %v1641_v47  ;;  %v1643_v53 = vpop.f32.mrf.mxu0 }
  0xfa   :  { %v1644_v54 = vadd.f32 %v1643_v53, %v1642_v50  ;;  %v1713_v55 = vpop.f32.mrf.mxu1 }
  0xfb   :  { %v1714_v56 = vadd.f32 %v1713_v55, %v1712_v51  ;;  %v1645_v57 = vpop.f32.mrf.mxu0 }
  0xfc   :  { %v1715_v58 = vpop.f32.mrf.mxu1 }
  0xfd   :  { %v2398_v59 = vadd.f32 %v1714_v56, %v1644_v54  ;;  %v1646_v60 = vpop.f32.mrf.mxu0 }
  0xfe   :  { %v1647_v61 = vadd.f32 %v1646_v60, %v1645_v57  ;;  %v1716_v62 = vpop.f32.mrf.mxu1 }
  0xff   :  { %v1717_v63 = vadd.f32 %v1716_v62, %v1715_v58  ;;  %v1648_v0 = vpop.f32.mrf.mxu0 }
 0x100   :  { %v1718_v1 = vpop.f32.mrf.mxu1 }
 0x101   :  { %v2400_v2 = vadd.f32 %v1717_v63, %v1647_v61  ;;  %v1649_v3 = vpop.f32.mrf.mxu0 }
 0x102   :  { %v1650_v4 = vadd.f32 %v1649_v3, %v1648_v0  ;;  %v1719_v5 = vpop.f32.mrf.mxu1 }
 0x103   :  { %v1720_v6 = vadd.f32 %v1719_v5, %v1718_v1  ;;  %v1651_v7 = vpop.f32.mrf.mxu0 }
 0x104   :  { %v1721_v8 = vpop.f32.mrf.mxu1 }
 0x105   :  { %v2402_v9 = vadd.f32 %v1720_v6, %v1650_v4  ;;  %v1652_v10 = vpop.f32.mrf.mxu0 }
 0x106   :  { %v1653_v11 = vadd.f32 %v1652_v10, %v1651_v7  ;;  %v1722_v12 = vpop.f32.mrf.mxu1 }
 0x107   :  { %v1723_v13 = vadd.f32 %v1722_v12, %v1721_v8  ;;  %v1654_v14 = vpop.f32.mrf.mxu0 }
 0x108   :  { %v1724_v15 = vpop.f32.mrf.mxu1 }
 0x109   :  { %v2404_v16 = vadd.f32 %v1723_v13, %v1653_v11  ;;  %v1655_v17 = vpop.f32.mrf.mxu0 }
 0x10a   :  { %v1656_v18 = vadd.f32 %v1655_v17, %v1654_v14  ;;  %v1725_v19 = vpop.f32.mrf.mxu1 }
 0x10b   :  { %v1726_v20 = vadd.f32 %v1725_v19, %v1724_v15  ;;  %v1657_v21 = vpop.f32.mrf.mxu0 }
 0x10c   :  { %v1727_v22 = vpop.f32.mrf.mxu1 }
 0x10d   :  { %v2406_v23 = vadd.f32 %v1726_v20, %v1656_v18  ;;  %v1658_v25 = vpop.f32.mrf.mxu0 }
 0x10e   :  { %v1659_v26 = vadd.f32 %v1658_v25, %v1657_v21  ;;  %v1728_v27 = vpop.f32.mrf.mxu1 }
 0x10f   :  { %v1729_v28 = vadd.f32 %v1728_v27, %v1727_v22  ;;  %v1660_v29 = vpop.f32.mrf.mxu0 }
 0x110   :  { %v1730_v30 = vpop.f32.mrf.mxu1 }
 0x111   :  { %v2408_v32 = vadd.f32 %v1729_v28, %v1659_v26  ;;  %v1661_v33 = vpop.f32.mrf.mxu0 }
 0x112   :  { %v1662_v34 = vadd.f32 %v1661_v33, %v1660_v29  ;;  %v1731_v35 = vpop.f32.mrf.mxu1 }
 0x113   :  { %v1732_v36 = vadd.f32 %v1731_v35, %v1730_v30  ;;  %v1663_v37 = vpop.f32.mrf.mxu0 }
 0x114   :  { %v1733_v39 = vpop.f32.mrf.mxu1 }
 0x115   :  { %v2410_v40 = vadd.f32 %v1732_v36, %v1662_v34  ;;  %v1664_v41 = vpop.f32.mrf.mxu0 }
 0x116   :  { %v1665_v42 = vadd.f32 %v1664_v41, %v1663_v37  ;;  %v1734_v43 = vpop.f32.mrf.mxu1 }
 0x117   :  { %v1735_v44 = vadd.f32 %v1734_v43, %v1733_v39  ;;  %v1666_v46 = vpop.f32.mrf.mxu0 }
 0x118   :  { %v1736_v47 = vpop.f32.mrf.mxu1 }
 0x119   :  { %v2412_v48 = vadd.f32 %v1735_v44, %v1665_v42  ;;  %v1667_v49 = vpop.f32.mrf.mxu0  ;;  %v2428_v42 = vld [vmem:[%s2562_s2] ss:$0 sm:$0xff] }
 0x11a   :  { %v1668_v50 = vadd.f32 %v1667_v49, %v1666_v46  ;;  %v1737_v51 = vpop.f32.mrf.mxu1 }
 0x11b   :  { %v1738_v53 = vadd.f32 %v1737_v51, %v1736_v47  ;;  %v1669_v54 = vpop.f32.mrf.mxu0 }
 0x11c   :  { %v1739_v55 = vpop.f32.mrf.mxu1 }
 0x11d   :  { %v2414_v56 = vadd.f32 %v1738_v53, %v1668_v50  ;;  %v1670_v57 = vpop.f32.mrf.mxu0 }
 0x11e   :  { %v1671_v58 = vadd.f32 %v1670_v57, %v1669_v54  ;;  %v1740_v60 = vpop.f32.mrf.mxu1 }
 0x11f   :  { %v1741_v61 = vadd.f32 %v1740_v60, %v1739_v55  ;;  %v1672_v62 = vpop.f32.mrf.mxu0 }
 0x120   :  { %v1742_v63 = vpop.f32.mrf.mxu1 }
 0x121   :  { %v2416_v0 = vadd.f32 %v1741_v61, %v1671_v58  ;;  %v1673_v1 = vpop.f32.mrf.mxu0 }
 0x122   :  { %v1674_v3 = vadd.f32 %v1673_v1, %v1672_v62  ;;  %v1743_v4 = vpop.f32.mrf.mxu1 }
 0x123   :  { %v1744_v5 = vadd.f32 %v1743_v4, %v1742_v63  ;;  %v1675_v6 = vpop.f32.mrf.mxu0 }
 0x124   :  { %v1745_v7 = vpop.f32.mrf.mxu1 }
 0x125   :  { %v2418_v8 = vadd.f32 %v1744_v5, %v1674_v3  ;;  %v1676_v10 = vpop.f32.mrf.mxu0 }
 0x126   :  { %v1677_v11 = vadd.f32 %v1676_v10, %v1675_v6  ;;  %v1746_v12 = vpop.f32.mrf.mxu1 }
 0x127   :  { %v1747_v13 = vadd.f32 %v1746_v12, %v1745_v7  ;;  %v1678_v14 = vpop.f32.mrf.mxu0 }
 0x128   :  { %v1748_v15 = vpop.f32.mrf.mxu1 }
 0x129   :  { %v2420_v17 = vadd.f32 %v1747_v13, %v1677_v11  ;;  %v1679_v18 = vpop.f32.mrf.mxu0 }
 0x12a   :  { %v1680_v19 = vadd.f32 %v1679_v18, %v1678_v14  ;;  %v1749_v20 = vpop.f32.mrf.mxu1 }
 0x12b   :  { %v1750_v21 = vadd.f32 %v1749_v20, %v1748_v15  ;;  %v1767_v22 = vpop.f32.mrf.mxu0 }
 0x12c   :  { %v1837_v25 = vpop.f32.mrf.mxu1 }
 0x12d   :  { %v2422_v26 = vadd.f32 %v1750_v21, %v1680_v19  ;;  %v1768_v27 = vpop.f32.mrf.mxu0 }
 0x12e   :  { %v1769_v28 = vadd.f32 %v1768_v27, %v1767_v22  ;;  %v1838_v29 = vpop.f32.mrf.mxu1 }
 0x12f   :  { %v1770_v30 = vpop.f32.mrf.mxu0  ;;  %v1839_v34 = vadd.f32 %v1838_v29, %v1837_v25 }
 0x130   :  { %v1207_v33 = vadd.f32 %v1769_v28, %v2388_v24  ;;  %v1840_v35 = vpop.f32.mrf.mxu1  ;;  %v2434_v24 = vld [vmem:[%s2563_s3] ss:$0 sm:$0xff] }
 0x131   :  { %v1771_v36 = vpop.f32.mrf.mxu0 }
 0x132   :  { %v1312_v37 = vadd.f32 %v1839_v34, %v1207_v33  ;;  %v1772_v39 = vadd.f32 %v1771_v36, %v1770_v30  ;;  %v1841_v41 = vpop.f32.mrf.mxu1 }
 0x133   :  { %v1773_v43 = vpop.f32.mrf.mxu0  ;;  %v1842_v47 = vadd.f32 %v1841_v41, %v1840_v35 }
 0x134   :  { %v1382_v44 = vmax.f32 %v1312_v37, 0.0  ;;  %v1210_v46 = vadd.f32 %v1772_v39, %v2390_v31  ;;  %v1843_v49 = vpop.f32.mrf.mxu1 }
 0x135   :  { %v1774_v50 = vpop.f32.mrf.mxu0 }
 0x136   :  { %v1407_v51 = vmul.f32 %v2428_v42, %v1382_v44  ;;  %v1315_v53 = vadd.f32 %v1842_v47, %v1210_v46  ;;  %v1775_v54 = vadd.f32 %v1774_v50, %v1773_v43  ;;  %v1844_v55 = vpop.f32.mrf.mxu1 }
 0x137   :  { %v1776_v57 = vpop.f32.mrf.mxu0  ;;  %v1845_v61 = vadd.f32 %v1844_v55, %v1843_v49 }
 0x138   :  { %v1432_v58 = vadd.f32 %v2434_v24, %v1407_v51  ;;  %v1383_v60 = vmax.f32 %v1315_v53, 0.0  ;;  %v1215_v31 = vadd.f32 %v1775_v54, %v2392_v38  ;;  %v1846_v62 = vpop.f32.mrf.mxu1 }
 0x139   :  { %v1777_v63 = vpop.f32.mrf.mxu0 }
 0x13a   :  { %1451 = vst.msk [vmem:[%s2564_s4] sm:$0xff] %vm1450_vm0, %v1432_v58  ;;  %v1408_v1 = vmul.f32 %v2428_v42, %v1383_v60  ;;  %v1320_v3 = vadd.f32 %v1845_v61, %v1215_v31  ;;  %v1778_v4 = vadd.f32 %v1777_v63, %v1776_v57  ;;  %v1847_v5 = vpop.f32.mrf.mxu1 }
 0x13b   :  { %v1779_v6 = vpop.f32.mrf.mxu0  ;;  %v1848_v38 = vadd.f32 %v1847_v5, %v1846_v62 }
 0x13c   :  { %v1433_v7 = vadd.f32 %v2434_v24, %v1408_v1  ;;  %v1384_v10 = vmax.f32 %v1320_v3, 0.0  ;;  %v1218_v11 = vadd.f32 %v1778_v4, %v2394_v45  ;;  %v1849_v12 = vpop.f32.mrf.mxu1 }
 0x13d   :  { %v1780_v13 = vpop.f32.mrf.mxu0 }
 0x13e   :  { %1452 = vst.msk [vmem:[%s2564_s4 + $0x8] sm:$0xff] %vm1450_vm0, %v1433_v7  ;;  %v1409_v14 = vmul.f32 %v2428_v42, %v1384_v10  ;;  %v1323_v15 = vadd.f32 %v1848_v38, %v1218_v11  ;;  %v1781_v18 = vadd.f32 %v1780_v13, %v1779_v6  ;;  %v1850_v19 = vpop.f32.mrf.mxu1 }
 0x13f   :  { %v1782_v20 = vpop.f32.mrf.mxu0  ;;  %v1851_v45 = vadd.f32 %v1850_v19, %v1849_v12 }
 0x140   :  { %v1434_v21 = vadd.f32 %v2434_v24, %v1409_v14  ;;  %v1385_v22 = vmax.f32 %v1323_v15, 0.0  ;;  %v1223_v25 = vadd.f32 %v1781_v18, %v2396_v52  ;;  %v1852_v27 = vpop.f32.mrf.mxu1 }
 0x141   :  { %v1783_v28 = vpop.f32.mrf.mxu0 }
 0x142   :  { %1453 = vst.msk [vmem:[%s2564_s4 + $0x10] sm:$0xff] %vm1450_vm0, %v1434_v21  ;;  %v1410_v29 = vmul.f32 %v2428_v42, %v1385_v22  ;;  %v1328_v30 = vadd.f32 %v1851_v45, %v1223_v25  ;;  %v1784_v33 = vadd.f32 %v1783_v28, %v1782_v20  ;;  %v1853_v34 = vpop.f32.mrf.mxu1 }
 0x143   :  { %v1785_v35 = vpop.f32.mrf.mxu0  ;;  %v1854_v52 = vadd.f32 %v1853_v34, %v1852_v27 }
 0x144   :  { %v1435_v36 = vadd.f32 %v2434_v24, %v1410_v29  ;;  %v1386_v37 = vmax.f32 %v1328_v30, 0.0  ;;  %v1226_v39 = vadd.f32 %v1784_v33, %v2398_v59  ;;  %v1855_v41 = vpop.f32.mrf.mxu1 }
 0x145   :  { %v1786_v43 = vpop.f32.mrf.mxu0 }
 0x146   :  { %1454 = vst.msk [vmem:[%s2564_s4 + $0x18] sm:$0xff] %vm1450_vm0, %v1435_v36  ;;  %v1411_v44 = vmul.f32 %v2428_v42, %v1386_v37  ;;  %v1331_v46 = vadd.f32 %v1854_v52, %v1226_v39  ;;  %v1787_v47 = vadd.f32 %v1786_v43, %v1785_v35  ;;  %v1856_v49 = vpop.f32.mrf.mxu1 }
 0x147   :  { %v1788_v50 = vpop.f32.mrf.mxu0  ;;  %v1857_v59 = vadd.f32 %v1856_v49, %v1855_v41 }
 0x148   :  { %v1436_v51 = vadd.f32 %v2434_v24, %v1411_v44  ;;  %v1387_v53 = vmax.f32 %v1331_v46, 0.0  ;;  %v1231_v54 = vadd.f32 %v1787_v47, %v2400_v2  ;;  %v1858_v55 = vpop.f32.mrf.mxu1 }
 0x149   :  { %v1789_v57 = vpop.f32.mrf.mxu0 }
 0x14a   :  { %1455 = vst.msk [vmem:[%s2564_s4 + $0x20] sm:$0xff] %vm1450_vm0, %v1436_v51  ;;  %v1412_v58 = vmul.f32 %v2428_v42, %v1387_v53  ;;  %v1336_v60 = vadd.f32 %v1857_v59, %v1231_v54  ;;  %v1790_v31 = vadd.f32 %v1789_v57, %v1788_v50  ;;  %v1859_v61 = vpop.f32.mrf.mxu1 }
 0x14b   :  { %v1791_v62 = vpop.f32.mrf.mxu0  ;;  %v1860_v2 = vadd.f32 %v1859_v61, %v1858_v55 }
 0x14c   :  { %v1437_v63 = vadd.f32 %v2434_v24, %v1412_v58  ;;  %v1388_v1 = vmax.f32 %v1336_v60, 0.0  ;;  %v1234_v3 = vadd.f32 %v1790_v31, %v2402_v9  ;;  %v1861_v4 = vpop.f32.mrf.mxu1 }
 0x14d   :  { %v1792_v5 = vpop.f32.mrf.mxu0 }
 0x14e   :  { %1456 = vst.msk [vmem:[%s2564_s4 + $0x28] sm:$0xff] %vm1450_vm0, %v1437_v63  ;;  %v1413_v6 = vmul.f32 %v2428_v42, %v1388_v1  ;;  %v1339_v7 = vadd.f32 %v1860_v2, %v1234_v3  ;;  %v1793_v10 = vadd.f32 %v1792_v5, %v1791_v62  ;;  %v1862_v11 = vpop.f32.mrf.mxu1 }
 0x14f   :  { %v1794_v38 = vpop.f32.mrf.mxu0  ;;  %v1863_v9 = vadd.f32 %v1862_v11, %v1861_v4 }
 0x150   :  { %v1438_v12 = vadd.f32 %v2434_v24, %v1413_v6  ;;  %v1389_v13 = vmax.f32 %v1339_v7, 0.0  ;;  %v1239_v14 = vadd.f32 %v1793_v10, %v2404_v16  ;;  %v1864_v15 = vpop.f32.mrf.mxu1 }
 0x151   :  { %v1795_v18 = vpop.f32.mrf.mxu0 }
 0x152   :  { %1457 = vst.msk [vmem:[%s2564_s4 + $0x30] sm:$0xff] %vm1450_vm0, %v1438_v12  ;;  %v1414_v19 = vmul.f32 %v2428_v42, %v1389_v13  ;;  %v1344_v20 = vadd.f32 %v1863_v9, %v1239_v14  ;;  %v1796_v21 = vadd.f32 %v1795_v18, %v1794_v38  ;;  %v1865_v22 = vpop.f32.mrf.mxu1 }
 0x153   :  { %v1797_v25 = vpop.f32.mrf.mxu0  ;;  %v1866_v16 = vadd.f32 %v1865_v22, %v1864_v15 }
 0x154   :  { %v1439_v45 = vadd.f32 %v2434_v24, %v1414_v19  ;;  %v1390_v27 = vmax.f32 %v1344_v20, 0.0  ;;  %v1242_v28 = vadd.f32 %v1796_v21, %v2406_v23  ;;  %v1867_v29 = vpop.f32.mrf.mxu1 }
 0x155   :  { %v1798_v30 = vpop.f32.mrf.mxu0 }
 0x156   :  { %1458 = vst.msk [vmem:[%s2564_s4 + $0x38] sm:$0xff] %vm1450_vm0, %v1439_v45  ;;  %v1415_v33 = vmul.f32 %v2428_v42, %v1390_v27  ;;  %v1347_v34 = vadd.f32 %v1866_v16, %v1242_v28  ;;  %v1799_v35 = vadd.f32 %v1798_v30, %v1797_v25  ;;  %v1868_v36 = vpop.f32.mrf.mxu1 }
 0x157   :  { %v1800_v37 = vpop.f32.mrf.mxu0  ;;  %v1869_v23 = vadd.f32 %v1868_v36, %v1867_v29 }
 0x158   :  { %v1440_v39 = vadd.f32 %v2434_v24, %v1415_v33  ;;  %v1391_v52 = vmax.f32 %v1347_v34, 0.0  ;;  %v1247_v41 = vadd.f32 %v1799_v35, %v2408_v32  ;;  %v1870_v43 = vpop.f32.mrf.mxu1 }
 0x159   :  { %v1801_v44 = vpop.f32.mrf.mxu0 }
 0x15a   :  { %1459 = vst.msk [vmem:[%s2564_s4 + $0x40] sm:$0xff] %vm1450_vm0, %v1440_v39  ;;  %v1416_v46 = vmul.f32 %v2428_v42, %v1391_v52  ;;  %v1352_v47 = vadd.f32 %v1869_v23, %v1247_v41  ;;  %v1802_v49 = vadd.f32 %v1801_v44, %v1800_v37  ;;  %v1871_v50 = vpop.f32.mrf.mxu1 }
 0x15b   :  { %v1803_v51 = vpop.f32.mrf.mxu0  ;;  %v1872_v32 = vadd.f32 %v1871_v50, %v1870_v43 }
 0x15c   :  { %v1441_v53 = vadd.f32 %v2434_v24, %v1416_v46  ;;  %v1392_v54 = vmax.f32 %v1352_v47, 0.0  ;;  %v1250_v59 = vadd.f32 %v1802_v49, %v2410_v40  ;;  %v1873_v55 = vpop.f32.mrf.mxu1 }
 0x15d   :  { %v1804_v57 = vpop.f32.mrf.mxu0 }
 0x15e   :  { %1460 = vst.msk [vmem:[%s2564_s4 + $0x48] sm:$0xff] %vm1450_vm0, %v1441_v53  ;;  %v1417_v58 = vmul.f32 %v2428_v42, %v1392_v54  ;;  %v1355_v60 = vadd.f32 %v1872_v32, %v1250_v59  ;;  %v1805_v31 = vadd.f32 %v1804_v57, %v1803_v51  ;;  %v1874_v61 = vpop.f32.mrf.mxu1 }
 0x15f   :  { %v1806_v62 = vpop.f32.mrf.mxu0  ;;  %v1875_v40 = vadd.f32 %v1874_v61, %v1873_v55 }
 0x160   :  { %v1442_v63 = vadd.f32 %v2434_v24, %v1417_v58  ;;  %v1393_v1 = vmax.f32 %v1355_v60, 0.0  ;;  %v1255_v3 = vadd.f32 %v1805_v31, %v2412_v48  ;;  %v1876_v2 = vpop.f32.mrf.mxu1 }
 0x161   :  { %v1807_v4 = vpop.f32.mrf.mxu0 }
 0x162   :  { %1461 = vst.msk [vmem:[%s2564_s4 + $0x50] sm:$0xff] %vm1450_vm0, %v1442_v63  ;;  %v1418_v5 = vmul.f32 %v2428_v42, %v1393_v1  ;;  %v1360_v6 = vadd.f32 %v1875_v40, %v1255_v3  ;;  %v1808_v7 = vadd.f32 %v1807_v4, %v1806_v62  ;;  %v1877_v10 = vpop.f32.mrf.mxu1 }
 0x163   :  { %v1809_v11 = vpop.f32.mrf.mxu0  ;;  %v1878_v48 = vadd.f32 %v1877_v10, %v1876_v2 }
 0x164   :  { %v1443_v38 = vadd.f32 %v2434_v24, %v1418_v5  ;;  %v1394_v12 = vmax.f32 %v1360_v6, 0.0  ;;  %v1258_v13 = vadd.f32 %v1808_v7, %v2414_v56  ;;  %v1879_v14 = vpop.f32.mrf.mxu1 }
 0x165   :  { %v1810_v9 = vpop.f32.mrf.mxu0 }
 0x166   :  { %1462 = vst.msk [vmem:[%s2564_s4 + $0x58] sm:$0xff] %vm1450_vm0, %v1443_v38  ;;  %v1419_v15 = vmul.f32 %v2428_v42, %v1394_v12  ;;  %v1363_v18 = vadd.f32 %v1878_v48, %v1258_v13  ;;  %v1811_v19 = vadd.f32 %v1810_v9, %v1809_v11  ;;  %v1880_v20 = vpop.f32.mrf.mxu1 }
 0x167   :  { %v1812_v21 = vpop.f32.mrf.mxu0  ;;  %v1881_v56 = vadd.f32 %v1880_v20, %v1879_v14 }
 0x168   :  { %v1444_v22 = vadd.f32 %v2434_v24, %v1419_v15  ;;  %v1395_v25 = vmax.f32 %v1363_v18, 0.0  ;;  %v1263_v45 = vadd.f32 %v1811_v19, %v2416_v0  ;;  %v1882_v27 = vpop.f32.mrf.mxu1 }
 0x169   :  { %v1813_v28 = vpop.f32.mrf.mxu0 }
 0x16a   :  { %1463 = vst.msk [vmem:[%s2564_s4 + $0x60] sm:$0xff] %vm1450_vm0, %v1444_v22  ;;  %v1420_v16 = vmul.f32 %v2428_v42, %v1395_v25  ;;  %v1368_v29 = vadd.f32 %v1881_v56, %v1263_v45  ;;  %v1814_v30 = vadd.f32 %v1813_v28, %v1812_v21  ;;  %v1883_v33 = vpop.f32.mrf.mxu1 }
 0x16b   :  { %v1815_v34 = vpop.f32.mrf.mxu0  ;;  %v1884_v0 = vadd.f32 %v1883_v33, %v1882_v27 }
 0x16c   :  { %v1445_v35 = vadd.f32 %v2434_v24, %v1420_v16  ;;  %v1396_v36 = vmax.f32 %v1368_v29, 0.0  ;;  %v1266_v37 = vadd.f32 %v1814_v30, %v2418_v8  ;;  %v1885_v39 = vpop.f32.mrf.mxu1 }
 0x16d   :  { %v1816_v52 = vpop.f32.mrf.mxu0 }
 0x16e   :  { %1464 = vst.msk [vmem:[%s2564_s4 + $0x68] sm:$0xff] %vm1450_vm0, %v1445_v35  ;;  %v1421_v41 = vmul.f32 %v2428_v42, %v1396_v36  ;;  %v1371_v23 = vadd.f32 %v1884_v0, %v1266_v37  ;;  %v1817_v43 = vadd.f32 %v1816_v52, %v1815_v34  ;;  %v1886_v44 = vpop.f32.mrf.mxu1 }
 0x16f   :  { %v1818_v46 = vpop.f32.mrf.mxu0  ;;  %v1887_v8 = vadd.f32 %v1886_v44, %v1885_v39 }
 0x170   :  { %v1446_v47 = vadd.f32 %v2434_v24, %v1421_v41  ;;  %v1397_v49 = vmax.f32 %v1371_v23, 0.0  ;;  %v1271_v50 = vadd.f32 %v1817_v43, %v2420_v17  ;;  %v1888_v51 = vpop.f32.mrf.mxu1 }
 0x171   :  { %v1819_v53 = vpop.f32.mrf.mxu0 }
 0x172   :  { %1465 = vst.msk [vmem:[%s2564_s4 + $0x70] sm:$0xff] %vm1450_vm0, %v1446_v47  ;;  %v1422_v54 = vmul.f32 %v2428_v42, %v1397_v49  ;;  %v1376_v59 = vadd.f32 %v1887_v8, %v1271_v50  ;;  %v1820_v32 = vadd.f32 %v1819_v53, %v1818_v46  ;;  %v1889_v55 = vpop.f32.mrf.mxu1 }
 0x173   :  { %v1890_v31 = vadd.f32 %v1889_v55, %v1888_v51 }
 0x174   :  { %v1447_v57 = vadd.f32 %v2434_v24, %v1422_v54  ;;  %v1398_v58 = vmax.f32 %v1376_v59, 0.0  ;;  %v1274_v60 = vadd.f32 %v1820_v32, %v2422_v26 }
 0x176   :  { %1466 = vst.msk [vmem:[%s2564_s4 + $0x78] sm:$0xff] %vm1450_vm0, %v1447_v57  ;;  %v1423_v17 = vmul.f32 %v2428_v42, %v1398_v58  ;;  %v1379_v61 = vadd.f32 %v1890_v31, %v1274_v60 }
 0x178   :  { %v1448_v62 = vadd.f32 %v2434_v24, %v1423_v17  ;;  %v1399_v63 = vmax.f32 %v1379_v61, 0.0 }
 0x17a   :  { %1467 = vst.msk [vmem:[%s2564_s4 + $0x80] sm:$0xff] %vm1450_vm0, %v1448_v62  ;;  %v1424_v1 = vmul.f32 %v2428_v42, %v1399_v63 }
 0x17c   :  { %v1449_v26 = vadd.f32 %v2434_v24, %v1424_v1 }
 0x17e   :  { %1468 = vst.msk [vmem:[%s2564_s4 + $0x88] sm:$0xff] %vm1450_vm0, %v1449_v26 }

// kernel: lstm_forward.5
= control target key start
LH: loop header
LB: loop body
LE: loop exit
PB: predicated region body
PF: predicated region fallthrough
CT: control target
= control target key end

     0   :  { %v132_v0 = vlaneseq  ;;  %v1489_v4 = vmov 1983009808   ;;  %vm1491_vm0 = vmmov 0   ;;  %vm1262_vm1 = vcmask 195584   ;;  %s1850_s1 = inlined_call_operand.vmem [shape: f32[24,3456], index: 1, kind: input, shape index: {}]   ;;  %s1851_s0 = inlined_call_operand.vmem [shape: f32[2,3456], index: 0, kind: input, shape index: {}]   ;;  %s1852_s3 = inlined_call_operand.vmem [shape: f32[12,24], index: 3, kind: input, shape index: {}]   ;;  %s1853_s5 = inlined_call_operand.vmem [shape: f32[9,12], index: 5, kind: input, shape index: {}]   ;;  %s1854_s2 = inlined_call_operand.vmem [shape: f32[1,24], index: 2, kind: input, shape index: {}]   ;;  %s1855_s4 = inlined_call_operand.vmem [shape: f32[1,12], index: 4, kind: input, shape index: {}]   ;;  %s1856_s6 = inlined_call_operand.vmem [shape: f32[1,9], index: 6, kind: input, shape index: {}]   ;;  %s1857_s7 = inlined_call_operand.vmem [shape: f32[2,9], index: 7, kind: output, shape index: {}]  }
   0x1   :  { %v88_v1 = vld [vmem:[%s1850_s1 + $0x1b8] sm:$0xff]  ;;  %v90_v2 = vld [vmem:[%s1850_s1 + $0x1c8] sm:$0xff]  ;;  %v87_v3 = vld [vmem:[%s1850_s1 + $0x1b0] sm:$0xff]  ;;  %v130_v5 = vunpack.c.l.s4 %v1489_v4  ;;  %vm1351_vm2 = vcmask 97280   ;;  %vm1431_vm3 = vcmask 66560  }
   0x2   :  { %299 = vmatprep.subr.mxu0 %v88_v1  ;;  %369 = vmatprep.subr.mxu1 %v90_v2  ;;  %v89_v6 = vld [vmem:[%s1850_s1 + $0x1c0] sm:$0xff]  ;;  %v63_v8 = vld [vmem:[%s1850_s1 + $0xf0] sm:$0xff]  ;;  %v133_v9 = vshrl.u32 %v132_v0, 7  ;;  %v60_v11 = vld [vmem:[%s1850_s1 + $0xd8] sm:$0xff] }
   0x3   :  { %v61_v7 = vld [vmem:[%s1850_s1 + $0xe0] sm:$0xff]  ;;  %300 = vmatpush1.xpose.msra.mxu0 %v87_v3  ;;  %370 = vmatpush1.xpose.msra.mxu1 %v89_v6  ;;  %v131_v10 = vunpack.c.0.s8 %v130_v5  ;;  %v62_v12 = vld [vmem:[%s1850_s1 + $0xe8] sm:$0xff]  ;;  %v36_v14 = vld [vmem:[%s1850_s1 + $0x18] sm:$0xff] }
   0x4   :  { %301 = vmatprep.subr.mxu0 %v61_v7  ;;  %371 = vmatprep.subr.mxu1 %v63_v8  ;;  %v34_v13 = vld [vmem:[%s1850_s1 + $0x8] sm:$0xff]  ;;  %v26_v15 = vld [vmem:[%s1851_s0] sm:$0xff]  ;;  %v35_v20 = vld [vmem:[%s1850_s1 + $0x10] sm:$0xff] }
   0x5   :  { %v1565_v16 = vsub.s32 %v131_v10, %v133_v9  ;;  %v128_v17 = vcombine.high %v26_v15, %v26_v15  ;;  %v33_v19 = vld [vmem:[%s1850_s1] sm:$0xff]  ;;  %v27_v23 = vld [vmem:[%s1851_s0 + $0x8] sm:$0xff]  ;;  %v92_v25 = vld [vmem:[%s1850_s1 + $0x1d8] sm:$0xff] }
   0x6   :  { %v94_v26 = vld [vmem:[%s1850_s1 + $0x1e8] sm:$0xff]  ;;  %v145_v28 = vcombine.high %v27_v23, %v27_v23  ;;  %v91_v29 = vld [vmem:[%s1850_s1 + $0x1d0] sm:$0xff]  ;;  %v93_v30 = vld [vmem:[%s1850_s1 + $0x1e0] sm:$0xff] }
   0x7   :  { %302 = vmatpush1.xpose.msra.mxu0 %v60_v11  ;;  %372 = vmatpush1.xpose.msra.mxu1 %v62_v12  ;;  %v135_v18 = vrot.slane %v26_v15, %v1565_v16  ;;  %v142_v21 = vrot.slane %v128_v17, %v1565_v16  ;;  %v152_v27 = vrot.slane %v27_v23, %v1565_v16  ;;  %v65_v32 = vld [vmem:[%s1850_s1 + $0x100] sm:$0xff]  ;;  %v67_v33 = vld [vmem:[%s1850_s1 + $0x110] sm:$0xff]  ;;  %v64_v37 = vld [vmem:[%s1850_s1 + $0xf8] sm:$0xff] }
   0x8   :  { %303 = vmatprep.subr.mxu0 %v34_v13  ;;  %373 = vmatprep.subr.mxu1 %v36_v14  ;;  %v159_v31 = vrot.slane %v145_v28, %v1565_v16  ;;  %v28_v36 = vld [vmem:[%s1851_s0 + $0x10] sm:$0xff]  ;;  %v66_v38 = vld [vmem:[%s1850_s1 + $0x108] sm:$0xff]  ;;  %v40_v40 = vld [vmem:[%s1850_s1 + $0x38] sm:$0xff] }
   0x9   :  { %v143_v22 = vcombine.high %v135_v18, %v135_v18  ;;  %v144_v24 = vcombine.high %v142_v21, %v142_v21  ;;  %v160_v34 = vcombine.high %v152_v27, %v152_v27  ;;  %v38_v39 = vld [vmem:[%s1850_s1 + $0x28] sm:$0xff]  ;;  %v162_v41 = vcombine.high %v28_v36, %v28_v36  ;;  %v37_v42 = vld [vmem:[%s1850_s1 + $0x20] sm:$0xff]  ;;  %v39_v43 = vld [vmem:[%s1850_s1 + $0x30] sm:$0xff] }
   0xa   :  { %v161_v35 = vcombine.high %v159_v31, %v159_v31  ;;  %v96_v44 = vld [vmem:[%s1850_s1 + $0x1f8] sm:$0xff]  ;;  %v98_v45 = vld [vmem:[%s1850_s1 + $0x208] sm:$0xff]  ;;  %v169_v46 = vrot.slane %v28_v36, %v1565_v16  ;;  %v95_v48 = vld [vmem:[%s1850_s1 + $0x1f0] sm:$0xff] }
   0xb   :  { %304 = vmatpush1.xpose.msra.mxu0 %v33_v19  ;;  %374 = vmatpush1.xpose.msra.mxu1 %v35_v20  ;;  %v176_v47 = vrot.slane %v162_v41, %v1565_v16  ;;  %v97_v49 = vld [vmem:[%s1850_s1 + $0x200] sm:$0xff]  ;;  %v71_v51 = vld [vmem:[%s1850_s1 + $0x130] sm:$0xff]  ;;  %v29_v54 = vld [vmem:[%s1851_s0 + $0x18] sm:$0xff] }
   0xc   :  { %337 = vmatprep.mubr.f32.mxu0 %v143_v22  ;;  %407 = vmatprep.mubr.f32.mxu1 %v144_v24  ;;  %v69_v50 = vld [vmem:[%s1850_s1 + $0x120] sm:$0xff]  ;;  %v177_v52 = vcombine.high %v169_v46, %v169_v46  ;;  %v68_v55 = vld [vmem:[%s1850_s1 + $0x118] sm:$0xff]  ;;  %v70_v56 = vld [vmem:[%s1850_s1 + $0x128] sm:$0xff]  ;;  %v179_v59 = vcombine.high %v29_v54, %v29_v54  ;;  %v186_v3 = vrot.slane %v29_v54, %v1565_v16 }
   0xd   :  { %439 = vmatprep.subr.mxu0 %v92_v25  ;;  %509 = vmatprep.subr.mxu1 %v94_v26  ;;  %v178_v53 = vcombine.high %v176_v47, %v176_v47  ;;  %v42_v57 = vld [vmem:[%s1850_s1 + $0x48] sm:$0xff]  ;;  %v44_v58 = vld [vmem:[%s1850_s1 + $0x58] sm:$0xff]  ;;  %v32_v60 = vld [vmem:[%s1851_s0 + $0x30] sm:$0x3f] }
   0xe   :  { %338 = vmatmul.mubr.f32.vlgmr.msra.gmra.mxu0 %v135_v18  ;;  %408 = vmatmul.mubr.f32.vlgmr.msra.gmra.mxu1 %v142_v21  ;;  %v230_v61 = vcombine.high %v32_v60, %v32_v60  ;;  %v1658_v62 = vrot.slane %v32_v60, %v1565_v16  ;;  %v41_v63 = vld [vmem:[%s1850_s1 + $0x40] sm:$0xff]  ;;  %v43_v0 = vld [vmem:[%s1850_s1 + $0x50] sm:$0xff]  ;;  %v100_v1 = vld [vmem:[%s1850_s1 + $0x218] sm:$0xff]  ;;  %v193_v4 = vrot.slane %v179_v59, %v1565_v16 }
   0xf   :  { %440 = vmatpush1.xpose.msra.mxu0 %v91_v29  ;;  %510 = vmatpush1.xpose.msra.mxu1 %v93_v30  ;;  %v102_v2 = vld [vmem:[%s1850_s1 + $0x228] sm:$0xff]  ;;  %v99_v6 = vld [vmem:[%s1850_s1 + $0x210] sm:$0xff]  ;;  %v101_v7 = vld [vmem:[%s1850_s1 + $0x220] sm:$0xff]  ;;  %v194_v10 = vcombine.high %v186_v3, %v186_v3 }
  0x10   :  { %441 = vmatprep.subr.mxu0 %v65_v32  ;;  %511 = vmatprep.subr.mxu1 %v67_v33  ;;  %v1675_v5 = vrot.slane %v230_v61, %v1565_v16  ;;  %v73_v8 = vld [vmem:[%s1850_s1 + $0x140] sm:$0xff]  ;;  %v75_v9 = vld [vmem:[%s1850_s1 + $0x150] sm:$0xff]  ;;  %v195_v11 = vcombine.high %v193_v4, %v193_v4  ;;  %v72_v13 = vld [vmem:[%s1850_s1 + $0x138] sm:$0xff]  ;;  %v245_v59 = vcombine.high %v1658_v62, %v1658_v62 }
  0x11   :  { %477 = vmatprep.mubr.f32.mxu0 %v160_v34  ;;  %547 = vmatprep.mubr.f32.mxu1 %v161_v35  ;;  %v30_v12 = vld [vmem:[%s1851_s0 + $0x20] sm:$0xff]  ;;  %v74_v14 = vld [vmem:[%s1850_s1 + $0x148] sm:$0xff]  ;;  %v48_v17 = vld [vmem:[%s1850_s1 + $0x78] sm:$0xff] }
  0x12   :  { %v46_v15 = vld [vmem:[%s1850_s1 + $0x68] sm:$0xff]  ;;  %v196_v18 = vcombine.high %v30_v12, %v30_v12  ;;  %v45_v19 = vld [vmem:[%s1850_s1 + $0x60] sm:$0xff]  ;;  %v47_v20 = vld [vmem:[%s1850_s1 + $0x70] sm:$0xff]  ;;  %v203_v23 = vrot.slane %v30_v12, %v1565_v16 }
  0x13   :  { %442 = vmatpush1.xpose.msra.mxu0 %v64_v37  ;;  %512 = vmatpush1.xpose.msra.mxu1 %v66_v38  ;;  %v104_v21 = vld [vmem:[%s1850_s1 + $0x238] sm:$0xff]  ;;  %v106_v22 = vld [vmem:[%s1850_s1 + $0x248] sm:$0xff]  ;;  %v103_v25 = vld [vmem:[%s1850_s1 + $0x230] sm:$0xff] }
  0x14   :  { %443 = vmatprep.subr.mxu0 %v38_v39  ;;  %513 = vmatprep.subr.mxu1 %v40_v40  ;;  %v210_v24 = vrot.slane %v196_v18, %v1565_v16  ;;  %v105_v26 = vld [vmem:[%s1850_s1 + $0x240] sm:$0xff]  ;;  %v79_v28 = vld [vmem:[%s1850_s1 + $0x170] sm:$0xff]  ;;  %v211_v29 = vcombine.high %v203_v23, %v203_v23  ;;  %v76_v32 = vld [vmem:[%s1850_s1 + $0x158] sm:$0xff] }
  0x15   :  { %v78_v33 = vld [vmem:[%s1850_s1 + $0x168] sm:$0xff]  ;;  %v52_v35 = vld [vmem:[%s1850_s1 + $0x98] sm:$0xff]  ;;  %v49_v37 = vld [vmem:[%s1850_s1 + $0x80] sm:$0xff] }
  0x16   :  { %v212_v30 = vcombine.high %v210_v24, %v210_v24  ;;  %v50_v34 = vld [vmem:[%s1850_s1 + $0x88] sm:$0xff]  ;;  %v51_v38 = vld [vmem:[%s1850_s1 + $0x90] sm:$0xff]  ;;  %v108_v39 = vld [vmem:[%s1850_s1 + $0x258] sm:$0xff] }
  0x17   :  { %444 = vmatpush1.xpose.msra.mxu0 %v37_v42  ;;  %514 = vmatpush1.xpose.msra.mxu1 %v39_v43  ;;  %v110_v40 = vld [vmem:[%s1850_s1 + $0x268] sm:$0xff]  ;;  %v107_v43 = vld [vmem:[%s1850_s1 + $0x250] sm:$0xff]  ;;  %v112_v54 = vld [vmem:[%s1850_s1 + $0x278] sm:$0xff] }
  0x18   :  { %579 = vmatprep.subr.mxu0 %v96_v44  ;;  %649 = vmatprep.subr.mxu1 %v98_v45  ;;  %v109_v44 = vld [vmem:[%s1850_s1 + $0x260] sm:$0xff]  ;;  %v84_v60 = vld [vmem:[%s1850_s1 + $0x198] sm:$0xff]  ;;  %v86_v61 = vld [vmem:[%s1850_s1 + $0x1a8] sm:$0xff] }
  0x19   :  { %v81_v45 = vld [vmem:[%s1850_s1 + $0x180] sm:$0xff] }
  0x1a   :  { %478 = vmatmul.mubr.f32.vlgmr.msra.gmra.mxu0 %v152_v27  ;;  %548 = vmatmul.mubr.f32.vlgmr.msra.gmra.mxu1 %v159_v31  ;;  %v77_v27 = vld [vmem:[%s1850_s1 + $0x160] sm:$0xff]  ;;  %v31_v31 = vld [vmem:[%s1851_s0 + $0x28] sm:$0xff] }
  0x1b   :  { %580 = vmatpush1.xpose.msra.mxu0 %v95_v48  ;;  %650 = vmatpush1.xpose.msra.mxu1 %v97_v49  ;;  %v213_v36 = vcombine.high %v31_v31, %v31_v31  ;;  %v220_v41 = vrot.slane %v31_v31, %v1565_v16  ;;  %v80_v48 = vld [vmem:[%s1850_s1 + $0x178] sm:$0xff]  ;;  %v82_v49 = vld [vmem:[%s1850_s1 + $0x188] sm:$0xff] }
  0x1c   :  { %581 = vmatprep.subr.mxu0 %v69_v50  ;;  %651 = vmatprep.subr.mxu1 %v71_v51  ;;  %v54_v50 = vld [vmem:[%s1850_s1 + $0xa8] sm:$0xff]  ;;  %v56_v51 = vld [vmem:[%s1850_s1 + $0xb8] sm:$0xff] }
  0x1d   :  { %617 = vmatprep.mubr.f32.mxu0 %v177_v52  ;;  %687 = vmatprep.mubr.f32.mxu1 %v178_v53  ;;  %v227_v42 = vrot.slane %v213_v36, %v1565_v16  ;;  %v83_v16 = vld [vmem:[%s1850_s1 + $0x190] sm:$0xff]  ;;  %v53_v52 = vld [vmem:[%s1850_s1 + $0xa0] sm:$0xff] }
  0x1e   :  { %v55_v53 = vld [vmem:[%s1850_s1 + $0xb0] sm:$0xff] }
  0x1f   :  { %582 = vmatpush1.xpose.msra.mxu0 %v68_v55  ;;  %652 = vmatpush1.xpose.msra.mxu1 %v70_v56  ;;  %v1490_v55 = vmov 0.0   ;;  %v111_v56 = vld [vmem:[%s1850_s1 + $0x270] sm:$0xff] }
  0x20   :  { %583 = vmatprep.subr.mxu0 %v42_v57  ;;  %653 = vmatprep.subr.mxu1 %v44_v58  ;;  %v113_v57 = vld [vmem:[%s1850_s1 + $0x280] sm:$0xff] }
  0x21   :  { %v85_v58 = vld [vmem:[%s1850_s1 + $0x1a0] sm:$0xff] }
  0x23   :  { %584 = vmatpush1.xpose.msra.mxu0 %v41_v63  ;;  %654 = vmatpush1.xpose.msra.mxu1 %v43_v0  ;;  %v58_v63 = vld [vmem:[%s1850_s1 + $0xc8] sm:$0xff]  ;;  %v57_v0 = vld [vmem:[%s1850_s1 + $0xc0] sm:$0xff] }
  0x24   :  { %719 = vmatprep.subr.mxu0 %v100_v1  ;;  %789 = vmatprep.subr.mxu1 %v102_v2  ;;  %v59_v1 = vld [vmem:[%s1850_s1 + $0xd0] sm:$0xff]  ;;  %v1254_v2 = vld [vmem:[%s1852_s3 + $0x8] sm:$0xf] }
  0x26   :  { %618 = vmatmul.mubr.f32.vlgmr.msra.gmra.mxu0 %v169_v46  ;;  %688 = vmatmul.mubr.f32.vlgmr.msra.gmra.mxu1 %v176_v47  ;;  %v228_v46 = vcombine.high %v220_v41, %v220_v41  ;;  %v229_v47 = vcombine.high %v227_v42, %v227_v42 }
  0x27   :  { %720 = vmatpush1.xpose.msra.mxu0 %v99_v6  ;;  %790 = vmatpush1.xpose.msra.mxu1 %v101_v7 }
  0x28   :  { %721 = vmatprep.subr.mxu0 %v73_v8  ;;  %791 = vmatprep.subr.mxu1 %v75_v9 }
  0x29   :  { %757 = vmatprep.mubr.f32.mxu0 %v194_v10  ;;  %827 = vmatprep.mubr.f32.mxu1 %v195_v11 }
  0x2b   :  { %722 = vmatpush1.xpose.msra.mxu0 %v72_v13  ;;  %792 = vmatpush1.xpose.msra.mxu1 %v74_v14 }
  0x2c   :  { %723 = vmatprep.subr.mxu0 %v46_v15  ;;  %793 = vmatprep.subr.mxu1 %v48_v17  ;;  %v1437_v17 = vld [vmem:[%s1854_s2] ss:$0 sm:$0xff] }
  0x2f   :  { %724 = vmatpush1.xpose.msra.mxu0 %v45_v19  ;;  %794 = vmatpush1.xpose.msra.mxu1 %v47_v20 }
  0x30   :  { %859 = vmatprep.subr.mxu0 %v104_v21  ;;  %929 = vmatprep.subr.mxu1 %v106_v22 }
  0x32   :  { %758 = vmatmul.mubr.f32.vlgmr.msra.gmra.mxu0 %v186_v3  ;;  %828 = vmatmul.mubr.f32.vlgmr.msra.gmra.mxu1 %v193_v4  ;;  %v1253_v3 = vld [vmem:[%s1852_s3] sm:$0xff] }
  0x33   :  { %860 = vmatpush1.xpose.msra.mxu0 %v103_v25  ;;  %930 = vmatpush1.xpose.msra.mxu1 %v105_v26 }
  0x34   :  { %861 = vmatprep.subr.mxu0 %v77_v27  ;;  %931 = vmatprep.subr.mxu1 %v79_v28 }
  0x35   :  { %897 = vmatprep.mubr.f32.mxu0 %v211_v29  ;;  %967 = vmatprep.mubr.f32.mxu1 %v212_v30 }
  0x37   :  { %862 = vmatpush1.xpose.msra.mxu0 %v76_v32  ;;  %932 = vmatpush1.xpose.msra.mxu1 %v78_v33 }
  0x38   :  { %863 = vmatprep.subr.mxu0 %v50_v34  ;;  %933 = vmatprep.subr.mxu1 %v52_v35 }
  0x3b   :  { %864 = vmatpush1.xpose.msra.mxu0 %v49_v37  ;;  %934 = vmatpush1.xpose.msra.mxu1 %v51_v38 }
  0x3c   :  { %999 = vmatprep.subr.mxu0 %v108_v39  ;;  %1069 = vmatprep.subr.mxu1 %v110_v40 }
  0x3e   :  { %898 = vmatmul.mubr.f32.vlgmr.msra.gmra.mxu0 %v203_v23  ;;  %968 = vmatmul.mubr.f32.vlgmr.msra.gmra.mxu1 %v210_v24 }
  0x3f   :  { %1000 = vmatpush1.xpose.msra.mxu0 %v107_v43  ;;  %1070 = vmatpush1.xpose.msra.mxu1 %v109_v44 }
  0x40   :  { %1001 = vmatprep.subr.mxu0 %v81_v45  ;;  %1071 = vmatprep.subr.mxu1 %v83_v16 }
  0x41   :  { %1037 = vmatprep.mubr.f32.mxu0 %v228_v46  ;;  %1107 = vmatprep.mubr.f32.mxu1 %v229_v47  ;;  %v1342_v47 = vld [vmem:[%s1853_s5] sm:$0xff] }
  0x43   :  { %1002 = vmatpush1.xpose.msra.mxu0 %v80_v48  ;;  %1072 = vmatpush1.xpose.msra.mxu1 %v82_v49  ;;  %v1438_v48 = vld [vmem:[%s1855_s4] ss:$0 sm:$0xff] }
  0x44   :  { %1003 = vmatprep.subr.mxu0 %v54_v50  ;;  %1073 = vmatprep.subr.mxu1 %v56_v51 }
  0x47   :  { %1004 = vmatpush1.xpose.msra.mxu0 %v53_v52  ;;  %1074 = vmatpush1.xpose.msra.mxu1 %v55_v53  ;;  %v1442_v52 = vld [vmem:[%s1856_s6] ss:$0 sm:$0xff] }
  0x48   :  { %1139 = vmatprep.subr.mxu0 %v112_v54  ;;  %1456 = vmatprep.subr.mxu1 %v1490_v55 }
  0x4a   :  { %1038 = vmatmul.mubr.f32.vlgmr.msra.gmra.mxu0 %v220_v41  ;;  %1108 = vmatmul.mubr.f32.vlgmr.msra.gmra.mxu1 %v227_v42 }
  0x4b   :  { %1140 = vmatpush1.xpose.msra.mxu0 %v111_v56  ;;  %1457 = vmatpush3.xpose.msra.mxu1 %v113_v57 }
  0x4c   :  { %1141 = vmatprep.subr.mxu0 %v85_v58  ;;  %1458 = vmatprep.subr.mxu1 %v1490_v55 }
  0x4d   :  { %1177 = vmatprep.mubr.f32.mxu0 %v245_v59  ;;  %1462 = vmatprep.mubr.msk.f32.mxu1 %vm1491_vm0, %v1490_v55 }
  0x4f   :  { %1142 = vmatpush1.xpose.msra.mxu0 %v84_v60  ;;  %1459 = vmatpush3.xpose.msra.mxu1 %v86_v61 }
  0x50   :  { %1143 = vmatprep.subr.mxu0 %v58_v63  ;;  %1460 = vmatprep.subr.mxu1 %v1490_v55 }
  0x53   :  { %1144 = vmatpush1.xpose.msra.mxu0 %v57_v0  ;;  %1461 = vmatpush3.xpose.msra.mxu1 %v59_v1 }
  0x54   :  { %1465 = vmatprep.subr.mxu0 %v1490_v55  ;;  %1472 = vmatprep.subr.mxu1 %v1490_v55 }
  0x56   :  { %1178 = vmatmul.mubr.f32.vlgmr.msra.gmra.mxu0 %v1658_v62  ;;  %1463 = vmatmul.mubr.f32.vlgmr.msra.gmra.mxu1 %v1675_v5  ;;  %v1343_v62 = vld [vmem:[%s1853_s5 + $0x8] sm:$0x1] }
  0x57   :  { %1469 = vmatprep.mubr.msk.f32.mxu0 %vm1491_vm0, %v1490_v55  ;;  %1476 = vmatprep.mubr.msk.f32.mxu1 %vm1491_vm0, %v1490_v55 }
  0x58   :  { %1466 = vmatpush3.xpose.msk.msra.mxu0 %vm1262_vm1, %v1254_v2  ;;  %1473 = vmatpush3.xpose.msk.msra.mxu1 %vm1351_vm2, %v1343_v62 }
  0x59   :  { %1467 = vmatprep.subr.mxu0 %v1490_v55  ;;  %1474 = vmatprep.subr.mxu1 %v1490_v55 }
  0x5c   :  { %1468 = vmatpush3.xpose.msk.msra.mxu0 %vm1262_vm1, %v1253_v3  ;;  %1475 = vmatpush3.xpose.msk.msra.mxu1 %vm1351_vm2, %v1342_v47 }
  0xce   :  { %v339_v4 = vpop.f32.mrf.mxu0  ;;  %v409_v5 = vpop.f32.mrf.mxu1 }
  0xcf   :  { %v340_v20 = vadd.f32 %v1437_v17, %v339_v4 }
  0xd0   :  { %v341_v6 = vpop.f32.mrf.mxu0  ;;  %v411_v7 = vpop.f32.mrf.mxu1 }
  0xd1   :  { %v410_v23 = vadd.f32 %v409_v5, %v340_v20 }
  0xda   :  { %v479_v8 = vpop.f32.mrf.mxu0  ;;  %v549_v9 = vpop.f32.mrf.mxu1 }
  0xdb   :  { %v480_v24 = vadd.f32 %v479_v8, %v410_v23 }
  0xdc   :  { %v481_v10 = vpop.f32.mrf.mxu0  ;;  %v551_v11 = vpop.f32.mrf.mxu1 }
  0xdd   :  { %v550_v25 = vadd.f32 %v549_v9, %v480_v24 }
  0xe6   :  { %v619_v12 = vpop.f32.mrf.mxu0  ;;  %v689_v13 = vpop.f32.mrf.mxu1 }
  0xe7   :  { %v620_v28 = vadd.f32 %v619_v12, %v550_v25 }
  0xe8   :  { %v621_v14 = vpop.f32.mrf.mxu0  ;;  %v691_v15 = vpop.f32.mrf.mxu1 }
  0xe9   :  { %v690_v31 = vadd.f32 %v689_v13, %v620_v28 }
  0xf2   :  { %v759_v18 = vpop.f32.mrf.mxu0  ;;  %v829_v19 = vpop.f32.mrf.mxu1 }
  0xf3   :  { %v760_v32 = vadd.f32 %v759_v18, %v690_v31 }
  0xf4   :  { %v761_v21 = vpop.f32.mrf.mxu0  ;;  %v831_v22 = vpop.f32.mrf.mxu1 }
  0xf5   :  { %v830_v33 = vadd.f32 %v829_v19, %v760_v32 }
  0xfe   :  { %v899_v26 = vpop.f32.mrf.mxu0  ;;  %v969_v27 = vpop.f32.mrf.mxu1 }
  0xff   :  { %v900_v36 = vadd.f32 %v899_v26, %v830_v33 }
 0x100   :  { %v901_v29 = vpop.f32.mrf.mxu0  ;;  %v971_v30 = vpop.f32.mrf.mxu1 }
 0x101   :  { %v970_v39 = vadd.f32 %v969_v27, %v900_v36 }
 0x10a   :  { %v1039_v34 = vpop.f32.mrf.mxu0  ;;  %v1109_v35 = vpop.f32.mrf.mxu1 }
 0x10b   :  { %v1040_v40 = vadd.f32 %v1039_v34, %v970_v39 }
 0x10c   :  { %v1041_v37 = vpop.f32.mrf.mxu0  ;;  %v1111_v38 = vpop.f32.mrf.mxu1 }
 0x10d   :  { %v1110_v41 = vadd.f32 %v1109_v35, %v1040_v40 }
 0x116   :  { %v1179_v42 = vpop.f32.mrf.mxu0  ;;  %v1249_v43 = vpop.f32.mrf.mxu1 }
 0x117   :  { %v1180_v44 = vadd.f32 %v1179_v42, %v1110_v41 }
 0x118   :  { %v1181_v45 = vpop.f32.mrf.mxu0  ;;  %v1464_v16 = vpop.f32.mrf.mxu1 }
 0x119   :  { %v1250_v46 = vadd.f32 %v1249_v43, %v1180_v44 }
 0x11b   :  { %1470 = vmatmul.mubr.msk.f32.vlgmr.msra.gmra.mxu0 %vm1262_vm1, %v1250_v46 }
 0x1db   :  { %v1338_v49 = vpop.f32.mrf.mxu0 }
 0x1dc   :  { %v1339_v50 = vadd.f32 %v1438_v48, %v1338_v49 }
 0x1dd   :  { %v1471_v51 = vpop.f32.mrf.mxu0 }
 0x1de   :  { %1477 = vmatmul.mubr.msk.f32.vlgmr.msra.gmra.mxu1 %vm1351_vm2, %v1339_v50 }
 0x29e   :  { %v1427_v53 = vpop.f32.mrf.mxu1 }
 0x29f   :  { %v1428_v54 = vadd.f32 %v1442_v52, %v1427_v53 }
 0x2a0   :  { %v1478_v55 = vpop.f32.mrf.mxu1 }
 0x2a1   :  { %1432 = vst.msk [vmem:[%s1857_s7] sm:$0x3] %vm1431_vm3, %v1428_v54 }

</bundles_post_ra>
